<compile_context>
chip_gen: v7x
topology: tpu7x:2x2x1
jax: 0.10.0
libtpu: 0.0.40
codegen_flags: <defaults>
</compile_context>

<pallas_src>
import functools
import math

import jax
import jax.numpy as jnp
from jax.experimental import pallas as pl
from jax.experimental.pallas import tpu as pltpu

BN_EPS = 1e-5      # BatchNorm1d default eps
NORM_EPS = 1e-5    # F.normalize eps (module default)
LANE = 128         # pad feature dims to this multiple (sufficient on v5e/v6e/v7x)

# Row order of the packed per-feature-vector slab.
(_VEC_PG1, _VEC_PBE1, _VEC_PG2, _VEC_PBE2,
 _VEC_PB3, _VEC_QG1, _VEC_QBE1, _VEC_QB2) = range(8)


def _round_up(x, m):
    return (x + m - 1) // m * m


def _vmem_capacity_bytes():
    try:
        cap = getattr(pltpu.get_tpu_info(), "vmem_capacity_bytes", None)
        if cap:
            return int(cap)
    except Exception:
        pass
    return 128 << 20


# ---------------- Pallas kernel ----------------------------------------------

def simsiam_kernel(xp_ref, xt_ref, pw1_ref, pw2_ref, pw3_ref, qw1_ref, qw2_ref,
                   vec_ref, out_ref, h1p_scr, h1t_scr, *, bt):
    """Row-tiled SimSiam forward.

    Grid: (num_row_tiles,).  Every step runs the first proj matmul on one row
    tile of each branch and stores it into persistent VMEM scratch; the last
    step computes the BatchNorm statistics over the full (resident) slabs and
    finishes the network + fused normalize/cosine.
    """
    f32 = jnp.float32
    bf16 = jnp.bfloat16

    tm = xp_ref.shape[0]
    bt_pad = h1p_scr.shape[0]
    hp = pw1_ref.shape[1]          # padded proj hidden size
    o = pw3_ref.shape[1]           # padded output size
    hq = qw1_ref.shape[1]          # padded pred hidden size
    inv_bt = 1.0 / bt              # compile-time constant (true batch size)

    i = pl.program_id(0)
    n = pl.num_programs(0)
    row0 = pl.multiple_of(i * tm, tm)

    # ---- stage 1 (every step): streamed first matmul into resident scratch ----
    h_p = jnp.dot(xp_ref[...], pw1_ref[...], preferred_element_type=f32)
    h_t = jnp.dot(xt_ref[...], pw1_ref[...], preferred_element_type=f32)
    if bt_pad != bt:
        # Zero out rows past the true batch (last tile may read unspecified data),
        # so the full-batch sums below stay exact.
        ridx = jax.lax.broadcasted_iota(jnp.int32, (tm, 1), 0) + row0
        valid = ridx < bt
        h_p = jnp.where(valid, h_p, 0.0)
        h_t = jnp.where(valid, h_t, 0.0)
    h1p_scr[pl.ds(row0, tm), :] = h_p
    h1t_scr[pl.ds(row0, tm), :] = h_t

    # ---- stage 2 (last step only): full-batch BN + remaining layers + cosine ----
    @pl.when(i == n - 1)
    def _():
        def vec(idx, dim):
            return vec_ref[idx:idx + 1, :dim]          # (1, dim) f32 parameter row

        row_mask = None
        if bt_pad != bt:
            row_mask = jax.lax.broadcasted_iota(jnp.int32, (bt_pad, 1), 0) < bt

        def bn_relu(h, gamma, beta):
            # BatchNorm1d (training mode, biased stats over the true bt rows) + ReLU.
            # Padded rows are zero on entry, so the sums (divided by bt) are exact.
            mu = jnp.sum(h, axis=0, keepdims=True) * inv_bt
            var = jnp.sum(h * h, axis=0, keepdims=True) * inv_bt - mu * mu
            var = jnp.maximum(var, 0.0)                # single-pass var can go < 0
            y = jnp.maximum(
                gamma * ((h - mu) * jax.lax.rsqrt(var + BN_EPS)) + beta, 0.0)
            if row_mask is not None:
                y = jnp.where(row_mask, y, 0.0)        # keep padded rows at zero
            return y

        def proj_tail(h1):
            a = bn_relu(h1, vec(_VEC_PG1, hp), vec(_VEC_PBE1, hp))
            h2 = jnp.dot(a.astype(bf16), pw2_ref[...], preferred_element_type=f32)
            b = bn_relu(h2, vec(_VEC_PG2, hp), vec(_VEC_PBE2, hp))
            return (jnp.dot(b.astype(bf16), pw3_ref[...], preferred_element_type=f32)
                    + vec(_VEC_PB3, o))

        z_p = proj_tail(h1p_scr[...])      # proj_net(pred)
        z_t = proj_tail(h1t_scr[...])      # proj_net(target); detach() is a fwd no-op

        # pred_net on the prediction branch only.
        g = jnp.dot(z_p.astype(bf16), qw1_ref[...], preferred_element_type=f32)
        if row_mask is not None:
            g = jnp.where(row_mask, g, 0.0)            # z_p padded rows carry the bias
        g = bn_relu(g, vec(_VEC_QG1, hq), vec(_VEC_QBE1, hq))
        p = (jnp.dot(g.astype(bf16), qw2_ref[...], preferred_element_type=f32)
             + vec(_VEC_QB2, o))

        # Fused F.normalize + cosine:
        #   cos = <z_t, p> / (max(||z_t||, eps) * max(||p||, eps))
        dot_tp = jnp.sum(z_t * p, axis=1, keepdims=True)
        s_t = jnp.sum(z_t * z_t, axis=1, keepdims=True)
        s_p = jnp.sum(p * p, axis=1, keepdims=True)
        eps2 = NORM_EPS * NORM_EPS
        cos = dot_tp * jax.lax.rsqrt(jnp.maximum(s_t, eps2) * jnp.maximum(s_p, eps2))

        out_ref[...] = (1.0 - cos).reshape(1, bt_pad)  # lane-dense store


# ---------------- parameter construction (deterministic, in-script) ----------

def make_params(key, input_size, proj_hidden, pred_hidden, output_size):
    """Raw f32 parameters.  Pre-BN biases (pb1, pb2, qb1) are omitted: they
    cancel exactly under BatchNorm with batch statistics (training mode)."""
    ks = jax.random.split(key, 13)

    def linear_w(k, fi, fo):
        return jax.random.normal(k, (fi, fo), jnp.float32) / jnp.sqrt(jnp.float32(fi))

    pw1 = linear_w(ks[0], input_size, proj_hidden)
    pw2 = linear_w(ks[1], proj_hidden, proj_hidden)
    pw3 = linear_w(ks[2], proj_hidden, output_size)
    qw1 = linear_w(ks[3], output_size, pred_hidden)
    qw2 = linear_w(ks[4], pred_hidden, output_size)

    pg1 = jax.random.uniform(ks[5], (proj_hidden,), jnp.float32, 0.5, 1.5)
    pbe1 = 0.1 * jax.random.normal(ks[6], (proj_hidden,), jnp.float32)
    pg2 = jax.random.uniform(ks[7], (proj_hidden,), jnp.float32, 0.5, 1.5)
    pbe2 = 0.1 * jax.random.normal(ks[8], (proj_hidden,), jnp.float32)
    pb3 = 0.1 * jax.random.normal(ks[9], (output_size,), jnp.float32)
    qg1 = jax.random.uniform(ks[10], (pred_hidden,), jnp.float32, 0.5, 1.5)
    qbe1 = 0.1 * jax.random.normal(ks[11], (pred_hidden,), jnp.float32)
    qb2 = 0.1 * jax.random.normal(ks[12], (output_size,), jnp.float32)

    return (pw1, pw2, pw3, qw1, qw2, pg1, pbe1, pg2, pbe2, pb3, qg1, qbe1, qb2)


def prepare_kernel_params(params):
    """Zero-pad all feature dims to LANE multiples (exact: padded gammas/betas/
    biases are 0), cast weights to bf16 (MXU operands) and pack the 8 small
    per-feature vectors into one f32 slab."""
    (pw1, pw2, pw3, qw1, qw2, pg1, pbe1, pg2, pbe2, pb3, qg1, qbe1, qb2) = params
    d, hp = pw1.shape
    hq = qw1.shape[1]
    o = pw3.shape[1]
    d_p, hp_p, hq_p, o_p = (_round_up(v, LANE) for v in (d, hp, hq, o))

    def pad_mat(w, r, c):
        return jnp.pad(w, ((0, r - w.shape[0]), (0, c - w.shape[1])))

    bf = jnp.bfloat16
    pw1p = pad_mat(pw1, d_p, hp_p).astype(bf)
    pw2p = pad_mat(pw2, hp_p, hp_p).astype(bf)
    pw3p = pad_mat(pw3, hp_p, o_p).astype(bf)
    qw1p = pad_mat(qw1, o_p, hq_p).astype(bf)
    qw2p = pad_mat(qw2, hq_p, o_p).astype(bf)

    pmax = max(hp_p, hq_p, o_p)
    rows = [jnp.pad(v, (0, pmax - v.shape[0])) for v in
            (pg1, pbe1, pg2, pbe2, pb3, qg1, qbe1, qb2)]
    vecs = jnp.stack(rows, axis=0).astype(jnp.float32)        # [8, pmax]
    return (pw1p, pw2p, pw3p, qw1p, qw2p, vecs)


# ---------------- wrapper ------------------------------------------------------

@functools.partial(jax.jit, static_argnames=("row_tile",))
def asymmetric_simsiam_loss(pred, target, kernel_params, row_tile=None):
    """pred, target: [B, T, ...] -> loss [B, T]."""
    B, T = pred.shape[0], pred.shape[1]
    D = int(math.prod(pred.shape[2:]))
    BT = B * T

    pw1, pw2, pw3, qw1, qw2, vecs = kernel_params
    d_pad, hp_pad = pw1.shape
    o_pad = pw3.shape[1]
    hq_pad = qw1.shape[1]
    assert d_pad >= D, (d_pad, D)

    vmem_cap = _vmem_capacity_bytes()
    if row_tile is None:
        # Bigger tiles on 128 MiB-VMEM parts (v5e/v6e), smaller on v7x (64 MiB).
        row_tile = 512 if vmem_cap >= (96 << 20) else 256
    tm = max(8, min(_round_up(row_tile, 8), _round_up(BT, 8)))
    bt_pad = _round_up(BT, tm)
    n_tiles = bt_pad // tm

    # bf16 cast fused with the zero column-pad -> one XLA op per branch,
    # no concat HBM round trip.
    def prep(x):
        x2 = x.reshape(BT, D).astype(jnp.bfloat16)
        if d_pad > D:
            x2 = jnp.pad(x2, ((0, 0), (0, d_pad - D)))
        return x2

    x_p = prep(pred)
    x_t = prep(target)
    operands = (x_p, x_t, pw1, pw2, pw3, qw1, qw2, vecs)

    # VMEM budget: double-buffered x tiles + resident weights + persistent h1
    # scratch + stage-2 f32 intermediates, capped at ~3/4 of physical VMEM.
    x_tile_bytes = 2 * 2 * tm * d_pad * 2
    weight_bytes = 2 * sum(int(w.size) * w.dtype.itemsize
                           for w in (pw1, pw2, pw3, qw1, qw2, vecs))
    scratch_bytes = 2 * bt_pad * hp_pad * 4
    live_bytes = 8 * bt_pad * max(hp_pad, o_pad, hq_pad) * 4
    budget = x_tile_bytes + weight_bytes + scratch_bytes + live_bytes + (2 << 20)
    vmem_limit = int(min(max(budget, 16 << 20), vmem_cap * 3 // 4))

    flops = 2 * BT * (2 * (d_pad * hp_pad + hp_pad * hp_pad + hp_pad * o_pad)
                      + o_pad * hq_pad + hq_pad * o_pad)
    bytes_accessed = sum(int(op.size) * op.dtype.itemsize for op in operands) + bt_pad * 4
    cost = pl.CostEstimate(flops=flops,
                           transcendentals=6 * BT + 4 * hp_pad + 2 * hq_pad,
                           bytes_accessed=bytes_accessed)

    kernel = functools.partial(simsiam_kernel, bt=BT)
    grid_spec = pltpu.PrefetchScalarGridSpec(
        num_scalar_prefetch=0,
        grid=(n_tiles,),
        in_specs=[
            pl.BlockSpec((tm, d_pad), lambda i: (i, 0)),         # x_pred tile
            pl.BlockSpec((tm, d_pad), lambda i: (i, 0)),         # x_target tile
            pl.BlockSpec((d_pad, hp_pad), lambda i: (0, 0)),     # pw1 (resident)
            pl.BlockSpec((hp_pad, hp_pad), lambda i: (0, 0)),    # pw2 (resident)
            pl.BlockSpec((hp_pad, o_pad), lambda i: (0, 0)),     # pw3 (resident)
            pl.BlockSpec((o_pad, hq_pad), lambda i: (0, 0)),     # qw1 (resident)
            pl.BlockSpec((hq_pad, o_pad), lambda i: (0, 0)),     # qw2 (resident)
            pl.BlockSpec((8, vecs.shape[1]), lambda i: (0, 0)),  # packed vectors
        ],
        out_specs=pl.BlockSpec((1, bt_pad), lambda i: (0, 0)),
        scratch_shapes=[pltpu.VMEM((bt_pad, hp_pad), jnp.float32),
                        pltpu.VMEM((bt_pad, hp_pad), jnp.float32)],
    )
    out = pl.pallas_call(
        kernel,
        out_shape=jax.ShapeDtypeStruct((1, bt_pad), jnp.float32),
        grid_spec=grid_spec,
        compiler_params=pltpu.CompilerParams(
            dimension_semantics=("arbitrary",),   # BN stats / scratch carried across rows
            vmem_limit_bytes=vmem_limit),
        cost_estimate=cost,
    )(*operands)
    return out[0, :BT].reshape(B, T)


# ---------------- pure-JAX reference (same bf16-matmul / f32-math recipe) -----

def reference_loss(pred, target, params):
    (pw1, pw2, pw3, qw1, qw2, pg1, pbe1, pg2, pbe2, pb3, qg1, qbe1, qb2) = params
    B, T = pred.shape[0], pred.shape[1]
    D = int(math.prod(pred.shape[2:]))
    p_in = pred.reshape(B * T, D).astype(jnp.float32)
    t_in = target.reshape(B * T, D).astype(jnp.float32)

    def mm(x, w):
        return jnp.dot(x.astype(jnp.bfloat16), w.astype(jnp.bfloat16),
                       preferred_element_type=jnp.float32)

    def bn_relu(x, g, b):
        mu = jnp.mean(x, axis=0, keepdims=True)
        var = jnp.maximum(jnp.mean(x * x, axis=0, keepdims=True) - mu * mu, 0.0)
        return jnp.maximum(g * ((x - mu) * jax.lax.rsqrt(var + BN_EPS)) + b, 0.0)

    def proj(x):
        h = bn_relu(mm(x, pw1), pg1, pbe1)
        h = bn_relu(mm(h, pw2), pg2, pbe2)
        return mm(h, pw3) + pb3

    z_t = proj(t_in)
    z_p = proj(p_in)
    g = bn_relu(mm(z_p, qw1), qg1, qbe1)
    pp = mm(g, qw2) + qb2

    def nrm(x):
        n = jnp.sqrt(jnp.sum(x * x, axis=1, keepdims=True))
        return x / jnp.maximum(n, NORM_EPS)

    cos = jnp.sum(nrm(z_t) * nrm(pp), axis=1)
    return (1.0 - cos).reshape(B, T)


if __name__ == "__main__":
    key = jax.random.PRNGKey(0)
    k_pred, k_tgt, k_params = jax.random.split(key, 3)

    # Small shapes consistent with the module's forward: pred/target [B, T, input_size].
    B, T = 2, 8
    input_size = 32
    proj_hidden_size = 64
    pred_hidden_size = 32
    output_size = 64

    pred = jax.random.normal(k_pred, (B, T, input_size), jnp.float32)
    target = jax.random.normal(k_tgt, (B, T, input_size), jnp.float32)

    raw_params = make_params(k_params, input_size, proj_hidden_size,
                             pred_hidden_size, output_size)
    kparams = prepare_kernel_params(raw_params)

    # row_tile=8 -> a 2-step row grid at this toy size (exercises the pipeline).
    loss = asymmetric_simsiam_loss(pred, target, kparams, row_tile=8)
    loss = jax.block_until_ready(loss)

    ref = reference_loss(pred, target, raw_params)
    assert loss.shape == (B, T)
    assert jnp.allclose(loss, ref, atol=1e-3, rtol=1e-3), (loss, ref)

    print("KERNEL_OK")
</pallas_src>

<mosaic_0001>
module attributes {stable_mosaic.version = 11 : i64} {
  func.func @simsiam_kernel(%arg0: i32, %arg1: memref<8x128xbf16, #tpu.memory_space<vmem>>, %arg2: memref<8x128xbf16, #tpu.memory_space<vmem>>, %arg3: memref<128x128xbf16, #tpu.memory_space<vmem>>, %arg4: memref<128x128xbf16, #tpu.memory_space<vmem>>, %arg5: memref<128x128xbf16, #tpu.memory_space<vmem>>, %arg6: memref<128x128xbf16, #tpu.memory_space<vmem>>, %arg7: memref<128x128xbf16, #tpu.memory_space<vmem>>, %arg8: memref<8x128xf32, #tpu.memory_space<vmem>>, %arg9: memref<1x16xf32, #tpu.memory_space<vmem>>, %arg10: memref<16x128xf32, #tpu.memory_space<vmem>>, %arg11: memref<16x128xf32, #tpu.memory_space<vmem>>) attributes {dimension_semantics = [#tpu.dimension_semantics<arbitrary>], iteration_bounds = array<i64: 2>, scalar_prefetch = 0 : i64, scratch_operands = 2 : i64, tpu.core_type = #tpu.core_type<tc>, window_params = [{transform_indices = @transform_0, window_bounds = array<i64: 8, 128>}, {transform_indices = @transform_1, window_bounds = array<i64: 8, 128>}, {pipeline_mode = #tpu.pipeline_mode<synchronous>, transform_indices = @transform_2, window_bounds = array<i64: 128, 128>}, {pipeline_mode = #tpu.pipeline_mode<synchronous>, transform_indices = @transform_3, window_bounds = array<i64: 128, 128>}, {pipeline_mode = #tpu.pipeline_mode<synchronous>, transform_indices = @transform_4, window_bounds = array<i64: 128, 128>}, {pipeline_mode = #tpu.pipeline_mode<synchronous>, transform_indices = @transform_5, window_bounds = array<i64: 128, 128>}, {pipeline_mode = #tpu.pipeline_mode<synchronous>, transform_indices = @transform_6, window_bounds = array<i64: 128, 128>}, {pipeline_mode = #tpu.pipeline_mode<synchronous>, transform_indices = @transform_7, window_bounds = array<i64: 8, 128>}, {pipeline_mode = #tpu.pipeline_mode<synchronous>, transform_indices = @transform_8, window_bounds = array<i64: 1, 16>}]} {
    %c8_i32 = arith.constant 8 : i32
    %0 = arith.muli %arg0, %c8_i32 : i32
    %1 = tpu.assume_multiple %0, 8 : i32
    %c0 = arith.constant 0 : index
    %c0_0 = arith.constant 0 : index
    %2 = vector.load %arg1[%c0, %c0_0] : memref<8x128xbf16, #tpu.memory_space<vmem>>, vector<8x128xbf16>
    %c0_1 = arith.constant 0 : index
    %c0_2 = arith.constant 0 : index
    %3 = vector.load %arg3[%c0_1, %c0_2] : memref<128x128xbf16, #tpu.memory_space<vmem>>, vector<128x128xbf16>
    %cst = arith.constant dense<0.000000e+00> : vector<8x128xf32>
    %4 = tpu.matmul %2, %3, %cst {dimension_numbers = #tpu.dot_dimension_numbers<[1], [0], [0], [1], [0, 0, 1, 1], [], []>} : vector<8x128xbf16>, vector<128x128xbf16>, vector<8x128xf32> -> vector<8x128xf32>
    %c0_3 = arith.constant 0 : index
    %c0_4 = arith.constant 0 : index
    %5 = vector.load %arg2[%c0_3, %c0_4] : memref<8x128xbf16, #tpu.memory_space<vmem>>, vector<8x128xbf16>
    %c0_5 = arith.constant 0 : index
    %c0_6 = arith.constant 0 : index
    %6 = vector.load %arg3[%c0_5, %c0_6] : memref<128x128xbf16, #tpu.memory_space<vmem>>, vector<128x128xbf16>
    %cst_7 = arith.constant dense<0.000000e+00> : vector<8x128xf32>
    %7 = tpu.matmul %5, %6, %cst_7 {dimension_numbers = #tpu.dot_dimension_numbers<[1], [0], [0], [1], [0, 0, 1, 1], [], []>} : vector<8x128xbf16>, vector<128x128xbf16>, vector<8x128xf32> -> vector<8x128xf32>
    %8 = arith.index_cast %1 : i32 to index
    %c0_8 = arith.constant 0 : index
    %9 = vector.load %arg10[%8, %c0_8] : memref<16x128xf32, #tpu.memory_space<vmem>>, vector<8x128xf32>
    tpu.vector_store %arg10[%8, %c0_8], %4 {strides = array<i32>} : memref<16x128xf32, #tpu.memory_space<vmem>>, vector<8x128xf32>,
    %10 = arith.index_cast %1 : i32 to index
    %c0_9 = arith.constant 0 : index
    %11 = vector.load %arg11[%10, %c0_9] : memref<16x128xf32, #tpu.memory_space<vmem>>, vector<8x128xf32>
    tpu.vector_store %arg11[%10, %c0_9], %7 {strides = array<i32>} : memref<16x128xf32, #tpu.memory_space<vmem>>, vector<8x128xf32>,
    %c1_i32 = arith.constant 1 : i32
    %12 = arith.cmpi eq, %arg0, %c1_i32 : i32
    %13 = arith.extui %12 : i1 to i32
    %c0_i32 = arith.constant 0 : i32
    %14 = arith.cmpi ne, %13, %c0_i32 : i32
    scf.if %14 {
      %c0_10 = arith.constant 0 : index
      %c0_11 = arith.constant 0 : index
      %15 = vector.load %arg10[%c0_10, %c0_11] : memref<16x128xf32, #tpu.memory_space<vmem>>, vector<16x128xf32>
      %c0_12 = arith.constant 0 : index
      %c0_13 = arith.constant 0 : index
      %16 = vector.load %arg8[%c0_12, %c0_13] : memref<8x128xf32, #tpu.memory_space<vmem>>, vector<1x128xf32>
      %c1 = arith.constant 1 : index
      %c0_14 = arith.constant 0 : index
      %17 = vector.load %arg8[%c1, %c0_14] : memref<8x128xf32, #tpu.memory_space<vmem>>, vector<1x128xf32>
      %cst_15 = arith.constant dense<0.000000e+00> : vector<128xf32>
      %18 = vector.multi_reduction <add>, %15, %cst_15 [0] : vector<16x128xf32> to vector<128xf32>
      %19 = vector.shape_cast %18 : vector<128xf32> to vector<1x128xf32>
      %cst_16 = arith.constant 6.250000e-02 : f32
      %20 = vector.broadcast %cst_16 : f32 to vector<1x128xf32>
      %21 = arith.mulf %19, %20 : vector<1x128xf32>
      %22 = arith.mulf %15, %15 : vector<16x128xf32>
      %cst_17 = arith.constant dense<0.000000e+00> : vector<128xf32>
      %23 = vector.multi_reduction <add>, %22, %cst_17 [0] : vector<16x128xf32> to vector<128xf32>
      %24 = vector.shape_cast %23 : vector<128xf32> to vector<1x128xf32>
      %cst_18 = arith.constant 6.250000e-02 : f32
      %25 = vector.broadcast %cst_18 : f32 to vector<1x128xf32>
      %26 = arith.mulf %24, %25 : vector<1x128xf32>
      %27 = arith.mulf %21, %21 : vector<1x128xf32>
      %28 = arith.subf %26, %27 : vector<1x128xf32>
      %cst_19 = arith.constant 0.000000e+00 : f32
      %29 = vector.broadcast %cst_19 : f32 to vector<1x128xf32>
      %30 = arith.maximumf %28, %29 : vector<1x128xf32>
      %31 = vector.broadcast %21 : vector<1x128xf32> to vector<16x128xf32>
      %32 = arith.subf %15, %31 : vector<16x128xf32>
      %cst_20 = arith.constant 9.99999974E-6 : f32
      %33 = vector.broadcast %cst_20 : f32 to vector<1x128xf32>
      %34 = arith.addf %30, %33 : vector<1x128xf32>
      %35 = math.rsqrt %34 : vector<1x128xf32>
      %36 = vector.broadcast %35 : vector<1x128xf32> to vector<16x128xf32>
      %37 = arith.mulf %32, %36 : vector<16x128xf32>
      %38 = vector.broadcast %16 : vector<1x128xf32> to vector<16x128xf32>
      %39 = arith.mulf %38, %37 : vector<16x128xf32>
      %40 = vector.broadcast %17 : vector<1x128xf32> to vector<16x128xf32>
      %41 = arith.addf %39, %40 : vector<16x128xf32>
      %cst_21 = arith.constant 0.000000e+00 : f32
      %42 = vector.broadcast %cst_21 : f32 to vector<16x128xf32>
      %43 = arith.maximumf %41, %42 : vector<16x128xf32>
      %44 = arith.truncf %43 : vector<16x128xf32> to vector<16x128xbf16>
      %c0_22 = arith.constant 0 : index
      %c0_23 = arith.constant 0 : index
      %45 = vector.load %arg4[%c0_22, %c0_23] : memref<128x128xbf16, #tpu.memory_space<vmem>>, vector<128x128xbf16>
      %cst_24 = arith.constant dense<0.000000e+00> : vector<16x128xf32>
      %46 = tpu.matmul %44, %45, %cst_24 {dimension_numbers = #tpu.dot_dimension_numbers<[1], [0], [0], [1], [0, 0, 1, 1], [], []>} : vector<16x128xbf16>, vector<128x128xbf16>, vector<16x128xf32> -> vector<16x128xf32>
      %c2 = arith.constant 2 : index
      %c0_25 = arith.constant 0 : index
      %47 = vector.load %arg8[%c2, %c0_25] : memref<8x128xf32, #tpu.memory_space<vmem>>, vector<1x128xf32>
      %c3 = arith.constant 3 : index
      %c0_26 = arith.constant 0 : index
      %48 = vector.load %arg8[%c3, %c0_26] : memref<8x128xf32, #tpu.memory_space<vmem>>, vector<1x128xf32>
      %cst_27 = arith.constant dense<0.000000e+00> : vector<128xf32>
      %49 = vector.multi_reduction <add>, %46, %cst_27 [0] : vector<16x128xf32> to vector<128xf32>
      %50 = vector.shape_cast %49 : vector<128xf32> to vector<1x128xf32>
      %cst_28 = arith.constant 6.250000e-02 : f32
      %51 = vector.broadcast %cst_28 : f32 to vector<1x128xf32>
      %52 = arith.mulf %50, %51 : vector<1x128xf32>
      %53 = arith.mulf %46, %46 : vector<16x128xf32>
      %cst_29 = arith.constant dense<0.000000e+00> : vector<128xf32>
      %54 = vector.multi_reduction <add>, %53, %cst_29 [0] : vector<16x128xf32> to vector<128xf32>
      %55 = vector.shape_cast %54 : vector<128xf32> to vector<1x128xf32>
      %cst_30 = arith.constant 6.250000e-02 : f32
      %56 = vector.broadcast %cst_30 : f32 to vector<1x128xf32>
      %57 = arith.mulf %55, %56 : vector<1x128xf32>
      %58 = arith.mulf %52, %52 : vector<1x128xf32>
      %59 = arith.subf %57, %58 : vector<1x128xf32>
      %cst_31 = arith.constant 0.000000e+00 : f32
      %60 = vector.broadcast %cst_31 : f32 to vector<1x128xf32>
      %61 = arith.maximumf %59, %60 : vector<1x128xf32>
      %62 = vector.broadcast %52 : vector<1x128xf32> to vector<16x128xf32>
      %63 = arith.subf %46, %62 : vector<16x128xf32>
      %cst_32 = arith.constant 9.99999974E-6 : f32
      %64 = vector.broadcast %cst_32 : f32 to vector<1x128xf32>
      %65 = arith.addf %61, %64 : vector<1x128xf32>
      %66 = math.rsqrt %65 : vector<1x128xf32>
      %67 = vector.broadcast %66 : vector<1x128xf32> to vector<16x128xf32>
      %68 = arith.mulf %63, %67 : vector<16x128xf32>
      %69 = vector.broadcast %47 : vector<1x128xf32> to vector<16x128xf32>
      %70 = arith.mulf %69, %68 : vector<16x128xf32>
      %71 = vector.broadcast %48 : vector<1x128xf32> to vector<16x128xf32>
      %72 = arith.addf %70, %71 : vector<16x128xf32>
      %cst_33 = arith.constant 0.000000e+00 : f32
      %73 = vector.broadcast %cst_33 : f32 to vector<16x128xf32>
      %74 = arith.maximumf %72, %73 : vector<16x128xf32>
      %75 = arith.truncf %74 : vector<16x128xf32> to vector<16x128xbf16>
      %c0_34 = arith.constant 0 : index
      %c0_35 = arith.constant 0 : index
      %76 = vector.load %arg5[%c0_34, %c0_35] : memref<128x128xbf16, #tpu.memory_space<vmem>>, vector<128x128xbf16>
      %cst_36 = arith.constant dense<0.000000e+00> : vector<16x128xf32>
      %77 = tpu.matmul %75, %76, %cst_36 {dimension_numbers = #tpu.dot_dimension_numbers<[1], [0], [0], [1], [0, 0, 1, 1], [], []>} : vector<16x128xbf16>, vector<128x128xbf16>, vector<16x128xf32> -> vector<16x128xf32>
      %c4 = arith.constant 4 : index
      %c0_37 = arith.constant 0 : index
      %78 = vector.load %arg8[%c4, %c0_37] : memref<8x128xf32, #tpu.memory_space<vmem>>, vector<1x128xf32>
      %79 = vector.broadcast %78 : vector<1x128xf32> to vector<16x128xf32>
      %80 = arith.addf %77, %79 : vector<16x128xf32>
      %c0_38 = arith.constant 0 : index
      %c0_39 = arith.constant 0 : index
      %81 = vector.load %arg11[%c0_38, %c0_39] : memref<16x128xf32, #tpu.memory_space<vmem>>, vector<16x128xf32>
      %c0_40 = arith.constant 0 : index
      %c0_41 = arith.constant 0 : index
      %82 = vector.load %arg8[%c0_40, %c0_41] : memref<8x128xf32, #tpu.memory_space<vmem>>, vector<1x128xf32>
      %c1_42 = arith.constant 1 : index
      %c0_43 = arith.constant 0 : index
      %83 = vector.load %arg8[%c1_42, %c0_43] : memref<8x128xf32, #tpu.memory_space<vmem>>, vector<1x128xf32>
      %cst_44 = arith.constant dense<0.000000e+00> : vector<128xf32>
      %84 = vector.multi_reduction <add>, %81, %cst_44 [0] : vector<16x128xf32> to vector<128xf32>
      %85 = vector.shape_cast %84 : vector<128xf32> to vector<1x128xf32>
      %cst_45 = arith.constant 6.250000e-02 : f32
      %86 = vector.broadcast %cst_45 : f32 to vector<1x128xf32>
      %87 = arith.mulf %85, %86 : vector<1x128xf32>
      %88 = arith.mulf %81, %81 : vector<16x128xf32>
      %cst_46 = arith.constant dense<0.000000e+00> : vector<128xf32>
      %89 = vector.multi_reduction <add>, %88, %cst_46 [0] : vector<16x128xf32> to vector<128xf32>
      %90 = vector.shape_cast %89 : vector<128xf32> to vector<1x128xf32>
      %cst_47 = arith.constant 6.250000e-02 : f32
      %91 = vector.broadcast %cst_47 : f32 to vector<1x128xf32>
      %92 = arith.mulf %90, %91 : vector<1x128xf32>
      %93 = arith.mulf %87, %87 : vector<1x128xf32>
      %94 = arith.subf %92, %93 : vector<1x128xf32>
      %cst_48 = arith.constant 0.000000e+00 : f32
      %95 = vector.broadcast %cst_48 : f32 to vector<1x128xf32>
      %96 = arith.maximumf %94, %95 : vector<1x128xf32>
      %97 = vector.broadcast %87 : vector<1x128xf32> to vector<16x128xf32>
      %98 = arith.subf %81, %97 : vector<16x128xf32>
      %cst_49 = arith.constant 9.99999974E-6 : f32
      %99 = vector.broadcast %cst_49 : f32 to vector<1x128xf32>
      %100 = arith.addf %96, %99 : vector<1x128xf32>
      %101 = math.rsqrt %100 : vector<1x128xf32>
      %102 = vector.broadcast %101 : vector<1x128xf32> to vector<16x128xf32>
      %103 = arith.mulf %98, %102 : vector<16x128xf32>
      %104 = vector.broadcast %82 : vector<1x128xf32> to vector<16x128xf32>
      %105 = arith.mulf %104, %103 : vector<16x128xf32>
      %106 = vector.broadcast %83 : vector<1x128xf32> to vector<16x128xf32>
      %107 = arith.addf %105, %106 : vector<16x128xf32>
      %cst_50 = arith.constant 0.000000e+00 : f32
      %108 = vector.broadcast %cst_50 : f32 to vector<16x128xf32>
      %109 = arith.maximumf %107, %108 : vector<16x128xf32>
      %110 = arith.truncf %109 : vector<16x128xf32> to vector<16x128xbf16>
      %c0_51 = arith.constant 0 : index
      %c0_52 = arith.constant 0 : index
      %111 = vector.load %arg4[%c0_51, %c0_52] : memref<128x128xbf16, #tpu.memory_space<vmem>>, vector<128x128xbf16>
      %cst_53 = arith.constant dense<0.000000e+00> : vector<16x128xf32>
      %112 = tpu.matmul %110, %111, %cst_53 {dimension_numbers = #tpu.dot_dimension_numbers<[1], [0], [0], [1], [0, 0, 1, 1], [], []>} : vector<16x128xbf16>, vector<128x128xbf16>, vector<16x128xf32> -> vector<16x128xf32>
      %c2_54 = arith.constant 2 : index
      %c0_55 = arith.constant 0 : index
      %113 = vector.load %arg8[%c2_54, %c0_55] : memref<8x128xf32, #tpu.memory_space<vmem>>, vector<1x128xf32>
      %c3_56 = arith.constant 3 : index
      %c0_57 = arith.constant 0 : index
      %114 = vector.load %arg8[%c3_56, %c0_57] : memref<8x128xf32, #tpu.memory_space<vmem>>, vector<1x128xf32>
      %cst_58 = arith.constant dense<0.000000e+00> : vector<128xf32>
      %115 = vector.multi_reduction <add>, %112, %cst_58 [0] : vector<16x128xf32> to vector<128xf32>
      %116 = vector.shape_cast %115 : vector<128xf32> to vector<1x128xf32>
      %cst_59 = arith.constant 6.250000e-02 : f32
      %117 = vector.broadcast %cst_59 : f32 to vector<1x128xf32>
      %118 = arith.mulf %116, %117 : vector<1x128xf32>
      %119 = arith.mulf %112, %112 : vector<16x128xf32>
      %cst_60 = arith.constant dense<0.000000e+00> : vector<128xf32>
      %120 = vector.multi_reduction <add>, %119, %cst_60 [0] : vector<16x128xf32> to vector<128xf32>
      %121 = vector.shape_cast %120 : vector<128xf32> to vector<1x128xf32>
      %cst_61 = arith.constant 6.250000e-02 : f32
      %122 = vector.broadcast %cst_61 : f32 to vector<1x128xf32>
      %123 = arith.mulf %121, %122 : vector<1x128xf32>
      %124 = arith.mulf %118, %118 : vector<1x128xf32>
      %125 = arith.subf %123, %124 : vector<1x128xf32>
      %cst_62 = arith.constant 0.000000e+00 : f32
      %126 = vector.broadcast %cst_62 : f32 to vector<1x128xf32>
      %127 = arith.maximumf %125, %126 : vector<1x128xf32>
      %128 = vector.broadcast %118 : vector<1x128xf32> to vector<16x128xf32>
      %129 = arith.subf %112, %128 : vector<16x128xf32>
      %cst_63 = arith.constant 9.99999974E-6 : f32
      %130 = vector.broadcast %cst_63 : f32 to vector<1x128xf32>
      %131 = arith.addf %127, %130 : vector<1x128xf32>
      %132 = math.rsqrt %131 : vector<1x128xf32>
      %133 = vector.broadcast %132 : vector<1x128xf32> to vector<16x128xf32>
      %134 = arith.mulf %129, %133 : vector<16x128xf32>
      %135 = vector.broadcast %113 : vector<1x128xf32> to vector<16x128xf32>
      %136 = arith.mulf %135, %134 : vector<16x128xf32>
      %137 = vector.broadcast %114 : vector<1x128xf32> to vector<16x128xf32>
      %138 = arith.addf %136, %137 : vector<16x128xf32>
      %cst_64 = arith.constant 0.000000e+00 : f32
      %139 = vector.broadcast %cst_64 : f32 to vector<16x128xf32>
      %140 = arith.maximumf %138, %139 : vector<16x128xf32>
      %141 = arith.truncf %140 : vector<16x128xf32> to vector<16x128xbf16>
      %c0_65 = arith.constant 0 : index
      %c0_66 = arith.constant 0 : index
      %142 = vector.load %arg5[%c0_65, %c0_66] : memref<128x128xbf16, #tpu.memory_space<vmem>>, vector<128x128xbf16>
      %cst_67 = arith.constant dense<0.000000e+00> : vector<16x128xf32>
      %143 = tpu.matmul %141, %142, %cst_67 {dimension_numbers = #tpu.dot_dimension_numbers<[1], [0], [0], [1], [0, 0, 1, 1], [], []>} : vector<16x128xbf16>, vector<128x128xbf16>, vector<16x128xf32> -> vector<16x128xf32>
      %c4_68 = arith.constant 4 : index
      %c0_69 = arith.constant 0 : index
      %144 = vector.load %arg8[%c4_68, %c0_69] : memref<8x128xf32, #tpu.memory_space<vmem>>, vector<1x128xf32>
      %145 = vector.broadcast %144 : vector<1x128xf32> to vector<16x128xf32>
      %146 = arith.addf %143, %145 : vector<16x128xf32>
      %147 = arith.truncf %80 : vector<16x128xf32> to vector<16x128xbf16>
      %c0_70 = arith.constant 0 : index
      %c0_71 = arith.constant 0 : index
      %148 = vector.load %arg6[%c0_70, %c0_71] : memref<128x128xbf16, #tpu.memory_space<vmem>>, vector<128x128xbf16>
      %cst_72 = arith.constant dense<0.000000e+00> : vector<16x128xf32>
      %149 = tpu.matmul %147, %148, %cst_72 {dimension_numbers = #tpu.dot_dimension_numbers<[1], [0], [0], [1], [0, 0, 1, 1], [], []>} : vector<16x128xbf16>, vector<128x128xbf16>, vector<16x128xf32> -> vector<16x128xf32>
      %c5 = arith.constant 5 : index
      %c0_73 = arith.constant 0 : index
      %150 = vector.load %arg8[%c5, %c0_73] : memref<8x128xf32, #tpu.memory_space<vmem>>, vector<1x128xf32>
      %c6 = arith.constant 6 : index
      %c0_74 = arith.constant 0 : index
      %151 = vector.load %arg8[%c6, %c0_74] : memref<8x128xf32, #tpu.memory_space<vmem>>, vector<1x128xf32>
      %cst_75 = arith.constant dense<0.000000e+00> : vector<128xf32>
      %152 = vector.multi_reduction <add>, %149, %cst_75 [0] : vector<16x128xf32> to vector<128xf32>
      %153 = vector.shape_cast %152 : vector<128xf32> to vector<1x128xf32>
      %cst_76 = arith.constant 6.250000e-02 : f32
      %154 = vector.broadcast %cst_76 : f32 to vector<1x128xf32>
      %155 = arith.mulf %153, %154 : vector<1x128xf32>
      %156 = arith.mulf %149, %149 : vector<16x128xf32>
      %cst_77 = arith.constant dense<0.000000e+00> : vector<128xf32>
      %157 = vector.multi_reduction <add>, %156, %cst_77 [0] : vector<16x128xf32> to vector<128xf32>
      %158 = vector.shape_cast %157 : vector<128xf32> to vector<1x128xf32>
      %cst_78 = arith.constant 6.250000e-02 : f32
      %159 = vector.broadcast %cst_78 : f32 to vector<1x128xf32>
      %160 = arith.mulf %158, %159 : vector<1x128xf32>
      %161 = arith.mulf %155, %155 : vector<1x128xf32>
      %162 = arith.subf %160, %161 : vector<1x128xf32>
      %cst_79 = arith.constant 0.000000e+00 : f32
      %163 = vector.broadcast %cst_79 : f32 to vector<1x128xf32>
      %164 = arith.maximumf %162, %163 : vector<1x128xf32>
      %165 = vector.broadcast %155 : vector<1x128xf32> to vector<16x128xf32>
      %166 = arith.subf %149, %165 : vector<16x128xf32>
      %cst_80 = arith.constant 9.99999974E-6 : f32
      %167 = vector.broadcast %cst_80 : f32 to vector<1x128xf32>
      %168 = arith.addf %164, %167 : vector<1x128xf32>
      %169 = math.rsqrt %168 : vector<1x128xf32>
      %170 = vector.broadcast %169 : vector<1x128xf32> to vector<16x128xf32>
      %171 = arith.mulf %166, %170 : vector<16x128xf32>
      %172 = vector.broadcast %150 : vector<1x128xf32> to vector<16x128xf32>
      %173 = arith.mulf %172, %171 : vector<16x128xf32>
      %174 = vector.broadcast %151 : vector<1x128xf32> to vector<16x128xf32>
      %175 = arith.addf %173, %174 : vector<16x128xf32>
      %cst_81 = arith.constant 0.000000e+00 : f32
      %176 = vector.broadcast %cst_81 : f32 to vector<16x128xf32>
      %177 = arith.maximumf %175, %176 : vector<16x128xf32>
      %178 = arith.truncf %177 : vector<16x128xf32> to vector<16x128xbf16>
      %c0_82 = arith.constant 0 : index
      %c0_83 = arith.constant 0 : index
      %179 = vector.load %arg7[%c0_82, %c0_83] : memref<128x128xbf16, #tpu.memory_space<vmem>>, vector<128x128xbf16>
      %cst_84 = arith.constant dense<0.000000e+00> : vector<16x128xf32>
      %180 = tpu.matmul %178, %179, %cst_84 {dimension_numbers = #tpu.dot_dimension_numbers<[1], [0], [0], [1], [0, 0, 1, 1], [], []>} : vector<16x128xbf16>, vector<128x128xbf16>, vector<16x128xf32> -> vector<16x128xf32>
      %c7 = arith.constant 7 : index
      %c0_85 = arith.constant 0 : index
      %181 = vector.load %arg8[%c7, %c0_85] : memref<8x128xf32, #tpu.memory_space<vmem>>, vector<1x128xf32>
      %182 = vector.broadcast %181 : vector<1x128xf32> to vector<16x128xf32>
      %183 = arith.addf %180, %182 : vector<16x128xf32>
      %184 = arith.mulf %146, %183 : vector<16x128xf32>
      %cst_86 = arith.constant dense<0.000000e+00> : vector<16xf32>
      %185 = vector.multi_reduction <add>, %184, %cst_86 [1] : vector<16x128xf32> to vector<16xf32>
      %186 = vector.shape_cast %185 : vector<16xf32> to vector<16x1xf32>
      %187 = arith.mulf %146, %146 : vector<16x128xf32>
      %cst_87 = arith.constant dense<0.000000e+00> : vector<16xf32>
      %188 = vector.multi_reduction <add>, %187, %cst_87 [1] : vector<16x128xf32> to vector<16xf32>
      %189 = vector.shape_cast %188 : vector<16xf32> to vector<16x1xf32>
      %190 = arith.mulf %183, %183 : vector<16x128xf32>
      %cst_88 = arith.constant dense<0.000000e+00> : vector<16xf32>
      %191 = vector.multi_reduction <add>, %190, %cst_88 [1] : vector<16x128xf32> to vector<16xf32>
      %192 = vector.shape_cast %191 : vector<16xf32> to vector<16x1xf32>
      %cst_89 = arith.constant 1.000000e-10 : f32
      %193 = vector.broadcast %cst_89 : f32 to vector<16x1xf32>
      %194 = arith.maximumf %189, %193 : vector<16x1xf32>
      %cst_90 = arith.constant 1.000000e-10 : f32
      %195 = vector.broadcast %cst_90 : f32 to vector<16x1xf32>
      %196 = arith.maximumf %192, %195 : vector<16x1xf32>
      %197 = arith.mulf %194, %196 : vector<16x1xf32>
      %198 = math.rsqrt %197 : vector<16x1xf32>
      %199 = arith.mulf %186, %198 : vector<16x1xf32>
      %cst_91 = arith.constant 1.000000e+00 : f32
      %200 = vector.broadcast %cst_91 : f32 to vector<16x1xf32>
      %201 = arith.subf %200, %199 : vector<16x1xf32>
      %202 = vector.shape_cast %201 : vector<16x1xf32> to vector<1x16xf32>
      %c0_92 = arith.constant 0 : index
      %c0_93 = arith.constant 0 : index
      %203 = vector.load %arg9[%c0_92, %c0_93] : memref<1x16xf32, #tpu.memory_space<vmem>>, vector<1x16xf32>
      tpu.vector_store %arg9[%c0_92, %c0_93], %202 {strides = array<i32>} : memref<1x16xf32, #tpu.memory_space<vmem>>, vector<1x16xf32>,
    } else {
    }
    return
  }
  func.func @transform_0(%arg0: i32) -> (i32, i32) {
    %c0_i32 = arith.constant 0 : i32
    %c0_i32_0 = arith.constant 0 : i32
    return %arg0, %c0_i32 : i32, i32
  }
  func.func @transform_1(%arg0: i32) -> (i32, i32) {
    %c0_i32 = arith.constant 0 : i32
    %c0_i32_0 = arith.constant 0 : i32
    return %arg0, %c0_i32 : i32, i32
  }
  func.func @transform_2(%arg0: i32) -> (i32, i32) {
    %c0_i32 = arith.constant 0 : i32
    %c0_i32_0 = arith.constant 0 : i32
    %c0_i32_1 = arith.constant 0 : i32
    return %c0_i32, %c0_i32_0 : i32, i32
  }
  func.func @transform_3(%arg0: i32) -> (i32, i32) {
    %c0_i32 = arith.constant 0 : i32
    %c0_i32_0 = arith.constant 0 : i32
    %c0_i32_1 = arith.constant 0 : i32
    return %c0_i32, %c0_i32_0 : i32, i32
  }
  func.func @transform_4(%arg0: i32) -> (i32, i32) {
    %c0_i32 = arith.constant 0 : i32
    %c0_i32_0 = arith.constant 0 : i32
    %c0_i32_1 = arith.constant 0 : i32
    return %c0_i32, %c0_i32_0 : i32, i32
  }
  func.func @transform_5(%arg0: i32) -> (i32, i32) {
    %c0_i32 = arith.constant 0 : i32
    %c0_i32_0 = arith.constant 0 : i32
    %c0_i32_1 = arith.constant 0 : i32
    return %c0_i32, %c0_i32_0 : i32, i32
  }
  func.func @transform_6(%arg0: i32) -> (i32, i32) {
    %c0_i32 = arith.constant 0 : i32
    %c0_i32_0 = arith.constant 0 : i32
    %c0_i32_1 = arith.constant 0 : i32
    return %c0_i32, %c0_i32_0 : i32, i32
  }
  func.func @transform_7(%arg0: i32) -> (i32, i32) {
    %c0_i32 = arith.constant 0 : i32
    %c0_i32_0 = arith.constant 0 : i32
    %c0_i32_1 = arith.constant 0 : i32
    return %c0_i32, %c0_i32_0 : i32, i32
  }
  func.func @transform_8(%arg0: i32) -> (i32, i32) {
    %c0_i32 = arith.constant 0 : i32
    %c0_i32_0 = arith.constant 0 : i32
    %c0_i32_1 = arith.constant 0 : i32
    return %c0_i32, %c0_i32_0 : i32, i32
  }
}

</mosaic_0001>

<bundles_post_ra>
// kernel: squeeze.1
= control target key start
LH: loop header
LB: loop body
LE: loop exit
PB: predicated region body
PF: predicated region fallthrough
CT: control target
= control target key end

     0   :  { %s85_s0 = inlined_call_operand.vmem [shape: f32[16], index: 0, kind: input, shape index: {}]   ;;  %s86_s1 = inlined_call_operand.hbm [shape: f32[2,8], index: 1, kind: output, shape index: {}]  }
   0x1   :  { %v5_v0 = vld [vmem:[%s85_s0] sm:$0x1] }
   0x2   :  { %2 = vsyncpa [#allocation1], 0  ;;  %6 = vst [vmem:[#allocation3] sm:$0x1] %v5_v0  ;;  %vm8_vm0 = vcmask 64512   ;;  %s58_s0 = smov 120  }
   0x3   :  { %s59_s8 = smov [#allocation0]  }
   0x4   :  { %s26_s9 = sshll.u32 %s59_s8, 4  ;;  %s27_s9 = int_to_ptr.vmem [resolvable:$true] %s26_s9 }
   0x5   :  { %s34_s10 = scalar_lea.vmem %s27_s9, 32  ;;  %p39_p1 = scmp.lt.s32.totalorder %s27_s9, %s27_s9 }
   0x6   :  { %p35_p0 = scmp.ne.s32.totalorder %s27_s9, %s34_s10  ;;  %p40_p2 = scmp.lt.s32.totalorder %s34_s10, %s34_s10 }
   0x8   :  { %p41_p3 = por %p40_p2, %p39_p1 }
   0x9   :  { %v10_v1 = vld [vmem:[#allocation3] sm:$0x1]  }
   0xa   :  { %v7_v2 = vld [vmem:[#allocation3] sm:$0x1]   ;;  %11 = vrot.lane.b32.xlu0 %v10_v1, %s58_s0  ;;  %p42_p4 = pnand %p41_p3, %p35_p0 }
   0xb   :  { %9 = vst.msk [vmem:[#allocation2] sm:$0x1] %vm8_vm0, %v7_v2  }
  0x7c   :  { %v12_v3 = vpop.permute.xlu0 %11  }
  0x7d   :  { %15 = vst.msk [vmem:[#allocation2 + $0x1] sm:$0x1] %vm8_vm0, %v12_v3  }
  0x84   :  { %v19_v4 = vld [vmem:[#allocation2] sm:$0x3] }
  0x85   :  { %21 = vst [vmem:[#allocation0] sm:$0x3] %v19_v4 }
  0x86   :  { %45 = shalt.err (!%p42_p4)
}
  0x87   :  { %s46_s13 = scalar_lea.hbm %s86_s1, 32 }
  0x88   :  { %p47_p5 = scmp.ne.s32.totalorder %s86_s1, %s46_s13  ;;  %p50_p6 = scmp.lt.u32.totalorder %s46_s13, %s86_s1 }
  0x8a   :  { %p52_p7 = pnand %p50_p6, %p47_p5 }
  0x8c   :  { %55 = shalt.err (!%p52_p7)
}
  0x8d   :  { %29 = dma.vmem_to_hbm [thread:$0]  %s27_s9, 32, %s86_s1, [#allocation1]  }
  0x8e   :  { %56 = dma.done.wait [#allocation1], 32  }
  0x8f   :  { %57 = vsyncadd [#allocation1], 4294967264 }
  0x90   :  { %31 = vsyncpa [#allocation1], 1 }

// kernel: asymmetric_simsiam_loss.1
= control target key start
LH: loop header
LB: loop body
LE: loop exit
PB: predicated region body
PF: predicated region fallthrough
CT: control target
= control target key end

     0   :  { %13 = vsyncpa [#allocation5], 0  ;;  %s2307_s0 = inlined_call_operand.vmem [shape: bf16[16,128], index: 0, kind: input, shape index: {}]   ;;  %s2308_s1 = inlined_call_operand.vmem [shape: bf16[16,128], index: 1, kind: input, shape index: {}]   ;;  %s2309_s2 = inlined_call_operand.vmem [shape: bf16[128,128], index: 2, kind: input, shape index: {}]   ;;  %s2310_s3 = inlined_call_operand.hbm [shape: bf16[128,128], index: 3, kind: input, shape index: {}]   ;;  %s2311_s4 = inlined_call_operand.hbm [shape: bf16[128,128], index: 4, kind: input, shape index: {}]   ;;  %s2312_s5 = inlined_call_operand.hbm [shape: bf16[128,128], index: 5, kind: input, shape index: {}]   ;;  %s2313_s6 = inlined_call_operand.hbm [shape: bf16[128,128], index: 6, kind: input, shape index: {}]   ;;  %s2314_s7 = inlined_call_operand.vmem [shape: f32[8,128], index: 7, kind: input, shape index: {}]   ;;  %s2315_s8 = inlined_call_operand.vmem [shape: f32[1,16], index: 8, kind: output, shape index: {}]  }
   0x1   :  { %14 = vsyncpa [#allocation7], 0 }
   0x2   :  { %15 = vsyncpa [#allocation10], 0  ;;  %s1964_s27 = smov 0  }
   0x3 LB: > { %s1970_s28 = sadd.s32 4294967295, %s1907_s27   ;;  %p1371_p0 = scmp.ge.s32.totalorder %s1907_s27, 1  ;;  %s1907_s27 = sphi %s1964_s27, %s21_s27  }
   0x4   : > { %p225_p1 = scmp.lt.s32.totalorder %s1907_s27, 3  ;;  %p2316_p2 = scmp.eq.s32.totalorder %s1970_s28, 0 }
   0x5   : > { %s1909_s30 = smov [#allocation6]   ;;  %s1910_s10 = smov [#allocation4]  }
   0x6   : > { %p1975_p3 = pnand %p1371_p0, %p225_p1  ;;  %s253_s9 = sshll.u32 %s1909_s30, 4  ;;  %s1979_s9 = int_to_ptr.vmem [resolvable:$true] %s253_s9 }
   0x7   : > { %s240_s11 = sshll.u32 %s1910_s10, 4  ;;  %s1911_s13 = smov [#allocation8]   ;;  %s1983_s11 = int_to_ptr.vmem [resolvable:$true] %s240_s11 }
   0x8   : > { %s2318_s29 = scalar_select %p1975_p3, 1, 0 }
   0x9   : > { %p1684_p4 = pneg %p1975_p3  ;;  %s266_s14 = sshll.u32 %s1911_s13, 4  ;;  %s1991_s14 = int_to_ptr.vmem [resolvable:$true] %s266_s14 }
   0xa   : > { %s1912_s15 = smov [#allocation9]   ;;  %s1777_s19 = scalar_lea.hbm %s2311_s4, 1024 }
   0xb   : > { %p1987_p5 = pnand %p2316_p2, %p1684_p4  ;;  %s1993_s16 = sshll.u32 %s1912_s15, 4  ;;  %s280_s16 = int_to_ptr.vmem [resolvable:$true] %s1993_s16 }
   0xc   : > { %p1778_p6 = scmp.ne.s32.totalorder %s2311_s4, %s1777_s19  ;;  %p1784_p10 = scmp.lt.u32.totalorder %s1777_s19, %s2311_s4 }
   0xd   : > { %p2003_p7 = pneg %p1987_p5 }
   0xf   : > { %p1780_p8 = pnand %p2003_p7, %p1778_p6 }
  0x11   : > { %p1781_p9 = pneg %p1780_p8 }
  0x13   : > { %p1786_p11 = pnand %p1784_p10, %p1781_p9 }
  0x15   : > { %1789 = shalt.err (!%p1786_p11)
}
  0x16   : > { %s1790_s25 = scalar_lea.vmem %s1979_s9, 1024  ;;  %p1798_p1 = scmp.lt.s32.totalorder %s1979_s9, %s1979_s9 }
  0x17   : > { %p1791_p12 = scmp.ne.s32.totalorder %s1979_s9, %s1790_s25  ;;  %p1799_p4 = scmp.lt.s32.totalorder %s1790_s25, %s1790_s25 }
  0x19   : > { %p1793_p13 = pnand %p1791_p12, %p2003_p7  ;;  %p1800_p6 = por %p1799_p4, %p1798_p1 }
  0x1b   : > { %p1794_p0 = pneg %p1793_p13 }
  0x1d   : > { %p1801_p8 = pnand %p1800_p6, %p1794_p0 }
  0x1f   : > { %1804 = shalt.err (!%p1801_p8)
}
  0x20   : > { %s1913_s26 = smov 64   ;;  %s1914_s30 = smov 4  }
  0x21   : > { %1690 = dma.hbm_to_vmem [thread:$0]  (!%p1987_p5), %s2311_s4, 1024, %s1979_s9, [#allocation7], %s1913_s26, %s1913_s26, %s1914_s30  }
  0x22   : > { %s1805_s18 = scalar_lea.hbm %s2310_s3, 1024 }
  0x23   : > { %p1806_p9 = scmp.ne.s32.totalorder %s2310_s3, %s1805_s18  ;;  %p1812_p12 = scmp.lt.u32.totalorder %s1805_s18, %s2310_s3 }
  0x25   : > { %p1808_p10 = pnand %p1806_p9, %p2003_p7 }
  0x27   : > { %p1809_p11 = pneg %p1808_p10 }
  0x29   : > { %p1814_p13 = pnand %p1812_p12, %p1809_p11 }
  0x2b   : > { %1817 = shalt.err (!%p1814_p13)
}
  0x2c   : > { %s1818_s9 = scalar_lea.vmem %s1983_s11, 1024  ;;  %p1826_p6 = scmp.lt.s32.totalorder %s1983_s11, %s1983_s11 }
  0x2d   : > { %p1819_p0 = scmp.ne.s32.totalorder %s1983_s11, %s1818_s9  ;;  %p1827_p8 = scmp.lt.s32.totalorder %s1818_s9, %s1818_s9 }
  0x2f   : > { %p1821_p1 = pnand %p1819_p0, %p2003_p7  ;;  %p1828_p9 = por %p1827_p8, %p1826_p6 }
  0x31   : > { %p1822_p4 = pneg %p1821_p1 }
  0x33   : > { %p1829_p10 = pnand %p1828_p9, %p1822_p4 }
  0x35   : > { %1832 = shalt.err (!%p1829_p10)
}
  0x36   : > { %1687 = dma.hbm_to_vmem [thread:$0]  (!%p1987_p5), %s2310_s3, 1024, %s1983_s11, [#allocation5], %s1913_s26, %s1913_s26, %s1914_s30  }
  0x37   : > { %s1833_s15 = scalar_lea.hbm %s2312_s5, 1024 }
  0x38   : > { %p1834_p11 = scmp.ne.s32.totalorder %s2312_s5, %s1833_s15  ;;  %p1840_p0 = scmp.lt.u32.totalorder %s1833_s15, %s2312_s5 }
  0x3a   : > { %p1836_p12 = pnand %p1834_p11, %p2003_p7 }
  0x3c   : > { %p1837_p13 = pneg %p1836_p12 }
  0x3e   : > { %p1842_p1 = pnand %p1840_p0, %p1837_p13 }
  0x40   : > { %1845 = shalt.err (!%p1842_p1)
}
  0x41   : > { %s1846_s11 = scalar_lea.vmem %s1991_s14, 1024  ;;  %p1854_p9 = scmp.lt.s32.totalorder %s1991_s14, %s1991_s14 }
  0x42   : > { %p1847_p4 = scmp.ne.s32.totalorder %s1991_s14, %s1846_s11  ;;  %p1855_p10 = scmp.lt.s32.totalorder %s1846_s11, %s1846_s11 }
  0x44   : > { %p1849_p6 = pnand %p1847_p4, %p2003_p7  ;;  %p1856_p11 = por %p1855_p10, %p1854_p9 }
  0x46   : > { %p1850_p8 = pneg %p1849_p6 }
  0x48   : > { %p1857_p12 = pnand %p1856_p11, %p1850_p8 }
  0x4a   : > { %1860 = shalt.err (!%p1857_p12)
}
  0x4b   : > { %1693 = dma.hbm_to_vmem [thread:$0]  (!%p1987_p5), %s2312_s5, 1024, %s1991_s14, [#allocation7], %s1913_s26, %s1913_s26, %s1914_s30  }
  0x4c   : > { %s1861_s25 = scalar_lea.hbm %s2313_s6, 1024 }
  0x4d   : > { %p1862_p13 = scmp.ne.s32.totalorder %s2313_s6, %s1861_s25  ;;  %p1868_p4 = scmp.lt.u32.totalorder %s1861_s25, %s2313_s6 }
  0x4f   : > { %p1864_p0 = pnand %p1862_p13, %p2003_p7 }
  0x51   : > { %p1865_p1 = pneg %p1864_p0 }
  0x53   : > { %p1870_p6 = pnand %p1868_p4, %p1865_p1 }
  0x55   : > { %1873 = shalt.err (!%p1870_p6)
}
  0x56   : > { %s1874_s18 = scalar_lea.vmem %s280_s16, 1024  ;;  %p1882_p11 = scmp.lt.s32.totalorder %s280_s16, %s280_s16 }
  0x57   : > { %p1875_p8 = scmp.ne.s32.totalorder %s280_s16, %s1874_s18  ;;  %p1883_p12 = scmp.lt.s32.totalorder %s1874_s18, %s1874_s18 }
  0x59   : > { %p1877_p9 = pnand %p1875_p8, %p2003_p7  ;;  %p1884_p2 = por %p1883_p12, %p1882_p11 }
  0x5b   : > { %p1878_p10 = pneg %p1877_p9 }
  0x5d   : > { %p1885_p3 = pnand %p1884_p2, %p1878_p10 }
  0x5f   : > { %1888 = shalt.err (!%p1885_p3)
}
  0x60   : > { %1696 = dma.hbm_to_vmem [thread:$0]  (!%p1987_p5), %s2313_s6, 1024, %s280_s16, [#allocation10], %s1913_s26, %s1913_s26, %s1914_s30  }
  0x61   : > { %p2321_p13 = scmp.ne.s32.totalorder %s2318_s29, 0 }
  0x62   : > { %p2322_p7 = scmp.eq.s32.totalorder (!%p2321_p13), %s1970_s28, 0 }
  0x63   : > { %312 = sbr.rel (%p2321_p13) target bundleno = 1534 (0x5fe), region = 52 }
  0x6a   : > { %1894 = dma.done.wait (%p2322_p7), [#allocation5], 1024   ;;  %p2323_p0 = pmov %p2322_p7 }
  0x6c   : > { %1896 = vsyncadd (%p2323_p0), [#allocation5], 4294966272  ;;  %p2324_p2 = pmov %p2323_p0 }
  0x6d   : > { %p2325_p3 = pmov %p2323_p0 }
  0x6e   : > { %1898 = dma.done.wait (%p2324_p2), [#allocation7], 2048  }
  0x6f   : > { %1900 = vsyncadd (%p2325_p3), [#allocation7], 4294965248  ;;  %p2326_p1 = pmov %p2323_p0 }
  0x70   : > { %p2327_p5 = pmov %p2323_p0 }
  0x71   : > { %1902 = dma.done.wait (%p2326_p1), [#allocation10], 1024  }
  0x72   : > { %1904 = vsyncadd (%p2327_p5), [#allocation10], 4294966272  ;;  %v1915_v0 = vmov 0.0   ;;  %vm1916_vm0 = vmmov 0   ;;  %v1723_v1 = vld [vmem:[%s2309_s2] sm:$0xff]   ;;  %v1724_v2 = vld [vmem:[%s2309_s2 + $0x8] sm:$0xff]  }
  0x73   : > { %1508 = vmatprep.subr.bf16.mxu0 %v1915_v0  ;;  %1528 = vmatprep.subr.bf16.mxu1 %v1915_v0  ;;  %v1725_v3 = vld [vmem:[%s2309_s2 + $0x10] sm:$0xff]   ;;  %v1726_v4 = vld [vmem:[%s2309_s2 + $0x18] sm:$0xff]   ;;  %v1727_v5 = vld [vmem:[%s2309_s2 + $0x20] sm:$0xff]   ;;  %p356_p4 = scmp.lt.s32.totalorder %s1970_s28, 1  ;;  %s1384_s26 = sshll.u32 %s1970_s28, 3 }
  0x74   : > { %1524 = vmatprep.mubr.msk.bf16.mxu0 %vm1916_vm0, %v1915_v0  ;;  %1544 = vmatprep.mubr.msk.bf16.mxu1 %vm1916_vm0, %v1915_v0  ;;  %v1728_v6 = vld [vmem:[%s2309_s2 + $0x28] sm:$0xff]   ;;  %v1729_v7 = vld [vmem:[%s2309_s2 + $0x30] sm:$0xff]   ;;  %v1730_v8 = vld [vmem:[%s2309_s2 + $0x38] sm:$0xff]   ;;  %s512_s30 = scalar_lea.vmem [#allocation2], %s1384_s26  ;;  %s514_s20 = scalar_lea.vmem [#allocation3], %s1384_s26 }
  0x75   : > { %1509 = vmatpush3.bf16.msra.mxu0 %v1723_v1  ;;  %1529 = vmatpush3.bf16.msra.mxu1 %v1723_v1  ;;  %s357_s25 = scalar_select %p356_p4, %s1970_s28, 1 }
  0x76   : > { %1510 = vmatprep.subr.bf16.mxu0 %v1915_v0  ;;  %1530 = vmatprep.subr.bf16.mxu1 %v1915_v0  ;;  %p1393_p6 = scmp.ne.s32.totalorder %s1970_s28, 1 }
  0x77   : > { %s1382_s15 = sshll.u32 %s357_s25, 2  ;;  %v2149_v19 = vld [vmem:[#allocation4] sm:$0xff] (!%p1393_p6)   ;;  %v1917_v20 = vmov (!%p1393_p6), 0.0   ;;  %v2154_v21 = vld [vmem:[#allocation4 + $0x8] sm:$0xff] (!%p1393_p6)   ;;  %vm1918_vm1 = vmmov (!%p1393_p6), 0   ;;  %v2162_v22 = vld [vmem:[#allocation4 + $0x10] sm:$0xff] (!%p1393_p6)  }
  0x78   : > { %s359_s29 = scalar_lea.vmem %s2307_s0, %s1382_s15  ;;  %s363_s22 = scalar_lea.vmem %s2308_s1, %s1382_s15  ;;  %v1734_v25 = vld [vmem:[#allocation4 + $0x18] sm:$0xff] (!%p1393_p6)   ;;  %v1735_v31 = vld [vmem:[#allocation4 + $0x20] sm:$0xff] (!%p1393_p6)   ;;  %v1736_v36 = vld [vmem:[#allocation4 + $0x28] sm:$0xff] (!%p1393_p6)   ;;  %vm1280_vm2 = vcmask (!%p1393_p6), 130112   ;;  %vm1283_vm3 = vcmask (!%p1393_p6), 122880  }
  0x79   : > { %1511 = vmatpush3.bf16.msra.mxu0 %v1724_v2  ;;  %1531 = vmatpush3.bf16.msra.mxu1 %v1724_v2  ;;  %v366_v9 = vld [vmem:[%s359_s29] sm:$0xf]  ;;  %v1737_v41 = vld [vmem:[#allocation4 + $0x30] sm:$0xff] (!%p1393_p6)   ;;  %v1738_v46 = vld [vmem:[#allocation4 + $0x38] sm:$0xff] (!%p1393_p6)  }
  0x7a   : > { %1512 = vmatprep.subr.bf16.mxu0 %v1915_v0  ;;  %1532 = vmatprep.subr.bf16.mxu1 %v1915_v0  ;;  %v471_v10 = vld [vmem:[%s363_s22] sm:$0xf] }
  0x7b   : > { %v2175_v55 = vld [vmem:[%s2314_s7] ss:$0 sm:$0xff] (!%p1393_p6)  ;;  %v2180_v58 = vld [vmem:[%s2314_s7 + $0x1] ss:$0 sm:$0xff] (!%p1393_p6) }
  0x7c   : > { %v2199_v2 = vld [vmem:[#allocation6] sm:$0xff] (!%p1393_p6)  }
  0x7d   : > { %1513 = vmatpush3.bf16.msra.mxu0 %v1725_v3  ;;  %1533 = vmatpush3.bf16.msra.mxu1 %v1725_v3  ;;  %v2203_v3 = vld [vmem:[#allocation6 + $0x8] sm:$0xff] (!%p1393_p6)  }
  0x7e   : > { %1514 = vmatprep.subr.bf16.mxu0 %v1915_v0  ;;  %1534 = vmatprep.subr.bf16.mxu1 %v1915_v0 }
  0x81   : > { %1515 = vmatpush3.bf16.msra.mxu0 %v1726_v4  ;;  %1535 = vmatpush3.bf16.msra.mxu1 %v1726_v4  ;;  %v2207_v4 = vld [vmem:[#allocation6 + $0x10] sm:$0xff] (!%p1393_p6)  }
  0x82   : > { %1516 = vmatprep.subr.bf16.mxu0 %v1915_v0  ;;  %1536 = vmatprep.subr.bf16.mxu1 %v1915_v0 }
  0x85   : > { %1517 = vmatpush3.bf16.msra.mxu0 %v1727_v5  ;;  %1537 = vmatpush3.bf16.msra.mxu1 %v1727_v5  ;;  %v2211_v5 = vld [vmem:[#allocation6 + $0x18] sm:$0xff] (!%p1393_p6)  }
  0x86   : > { %1518 = vmatprep.subr.bf16.mxu0 %v1915_v0  ;;  %1538 = vmatprep.subr.bf16.mxu1 %v1915_v0 }
  0x89   : > { %1519 = vmatpush3.bf16.msra.mxu0 %v1728_v6  ;;  %1539 = vmatpush3.bf16.msra.mxu1 %v1728_v6  ;;  %v2215_v6 = vld [vmem:[#allocation6 + $0x20] sm:$0xff] (!%p1393_p6)  }
  0x8a   : > { %1520 = vmatprep.subr.bf16.mxu0 %v1915_v0  ;;  %1540 = vmatprep.subr.bf16.mxu1 %v1915_v0 }
  0x8d   : > { %1521 = vmatpush3.bf16.msra.mxu0 %v1729_v7  ;;  %1541 = vmatpush3.bf16.msra.mxu1 %v1729_v7  ;;  %v2219_v7 = vld [vmem:[#allocation6 + $0x28] sm:$0xff] (!%p1393_p6)  }
  0x8e   : > { %1522 = vmatprep.subr.bf16.mxu0 %v1915_v0  ;;  %1542 = vmatprep.subr.bf16.mxu1 %v1915_v0 }
  0x91   : > { %1523 = vmatpush3.bf16.msra.mxu0 %v1730_v8  ;;  %1543 = vmatpush3.bf16.msra.mxu1 %v1730_v8  ;;  %v2223_v8 = vld [vmem:[#allocation6 + $0x30] sm:$0xff] (!%p1393_p6)  }
  0x92   : > { %1548 = vmatprep.subr.bf16.mxu0 (!%p1393_p6), %v1917_v20  ;;  %1568 = vmatprep.subr.bf16.mxu1 (!%p1393_p6), %v1917_v20 }
  0x94   : > { %1525 = vmatmul.mubr.bf16.vlgmr.msra.gmra.mrb[0].mxu0 %v366_v9  ;;  %1545 = vmatmul.mubr.bf16.vlgmr.msra.gmra.mrb[0].mxu1 %v471_v10  ;;  %v2226_v9 = vld [vmem:[#allocation6 + $0x38] sm:$0xff] (!%p1393_p6)  }
  0x95   : > { %1549 = vmatpush3.bf16.msra.mxu0 (!%p1393_p6), %v2149_v19  ;;  %1564 = vmatprep.mubr.msk.bf16.mxu0 (!%p1393_p6), %vm1918_vm1, %v1917_v20 }
  0x96   : > { %1550 = vmatprep.subr.bf16.mxu0 (!%p1393_p6), %v1917_v20  ;;  %1584 = vmatprep.mubr.msk.bf16.mxu1 (!%p1393_p6), %vm1918_vm1, %v1917_v20 }
  0x97   : > { %1569 = vmatpush3.bf16.msra.mxu1 (!%p1393_p6), %v2199_v2 }
  0x98   : > { %1570 = vmatprep.subr.bf16.mxu1 (!%p1393_p6), %v1917_v20 }
  0x99   : > { %1551 = vmatpush3.bf16.msra.mxu0 (!%p1393_p6), %v2154_v21 }
  0x9a   : > { %1552 = vmatprep.subr.bf16.mxu0 (!%p1393_p6), %v1917_v20 }
  0x9b   : > { %1571 = vmatpush3.bf16.msra.mxu1 (!%p1393_p6), %v2203_v3 }
  0x9c   : > { %1572 = vmatprep.subr.bf16.mxu1 (!%p1393_p6), %v1917_v20 }
  0x9d   : > { %1553 = vmatpush3.bf16.msra.mxu0 (!%p1393_p6), %v2162_v22 }
  0x9e   : > { %1554 = vmatprep.subr.bf16.mxu0 (!%p1393_p6), %v1917_v20 }
  0x9f   : > { %1573 = vmatpush3.bf16.msra.mxu1 (!%p1393_p6), %v2207_v4 }
  0xa0   : > { %1574 = vmatprep.subr.bf16.mxu1 (!%p1393_p6), %v1917_v20 }
  0xa1   : > { %1555 = vmatpush3.bf16.msra.mxu0 (!%p1393_p6), %v1734_v25 }
  0xa2   : > { %1556 = vmatprep.subr.bf16.mxu0 (!%p1393_p6), %v1917_v20 }
  0xa3   : > { %1575 = vmatpush3.bf16.msra.mxu1 (!%p1393_p6), %v2211_v5 }
  0xa4   : > { %1576 = vmatprep.subr.bf16.mxu1 (!%p1393_p6), %v1917_v20 }
  0xa5   : > { %1557 = vmatpush3.bf16.msra.mxu0 (!%p1393_p6), %v1735_v31 }
  0xa6   : > { %1558 = vmatprep.subr.bf16.mxu0 (!%p1393_p6), %v1917_v20 }
  0xa7   : > { %1577 = vmatpush3.bf16.msra.mxu1 (!%p1393_p6), %v2215_v6 }
  0xa8   : > { %1578 = vmatprep.subr.bf16.mxu1 (!%p1393_p6), %v1917_v20 }
  0xa9   : > { %1559 = vmatpush3.bf16.msra.mxu0 (!%p1393_p6), %v1736_v36 }
  0xaa   : > { %1560 = vmatprep.subr.bf16.mxu0 (!%p1393_p6), %v1917_v20 }
  0xab   : > { %1579 = vmatpush3.bf16.msra.mxu1 (!%p1393_p6), %v2219_v7 }
  0xac   : > { %1580 = vmatprep.subr.bf16.mxu1 (!%p1393_p6), %v1917_v20 }
  0xad   : > { %1561 = vmatpush3.bf16.msra.mxu0 (!%p1393_p6), %v1737_v41 }
  0xae   : > { %1562 = vmatprep.subr.bf16.mxu0 (!%p1393_p6), %v1917_v20 }
  0xaf   : > { %1581 = vmatpush3.bf16.msra.mxu1 (!%p1393_p6), %v2223_v8 }
  0xb0   : > { %1582 = vmatprep.subr.bf16.mxu1 (!%p1393_p6), %v1917_v20 }
  0xb1   : > { %1563 = vmatpush3.bf16.msra.mxu0 (!%p1393_p6), %v1738_v46 }
  0xb2   : > { %1588 = vmatprep.subr.bf16.mxu0 (!%p1393_p6), %v1917_v20 }
  0xb3   : > { %1583 = vmatpush3.bf16.msra.mxu1 (!%p1393_p6), %v2226_v9 }
  0xb4   : > { %1608 = vmatprep.subr.bf16.mxu1 (!%p1393_p6), %v1917_v20 }
 0x164   : > { %519 = sbr.rel (%p1393_p6) target bundleno = 1534 (0x5fe), region = 72 }
 0x167   : > { %v465_v11 = vpop.f32.mrb[0].mxu0  ;;  %v506_v12 = vpop.f32.mrb[0].mxu1 }
 0x168   : > { %513 = vst [vmem:[%s512_s30] sm:$0xff] %v465_v11  ;;  %515 = vst [vmem:[%s514_s20] sm:$0xff] %v506_v12  ;;  %v1526_v13 = vpop.f32.mrb[1].mxu0  ;;  %v1546_v14 = vpop.f32.mrb[1].mxu1 }
 0x169   : > { %v468_v15 = vpop.f32.mrb[2].mxu0  ;;  %v509_v16 = vpop.f32.mrb[2].mxu1 }
 0x16a   : > { %v1527_v17 = vpop.f32.mrb[3].mxu0  ;;  %v1547_v18 = vpop.f32.mrb[3].mxu1 }
 0x16f   : > { %v520_v23 = vld [vmem:[#allocation2] sm:$0xff]  ;;  %v521_v24 = vld [vmem:[#allocation2 + $0x8] sm:$0xff]  ;;  %v825_v10 = vld [vmem:[#allocation3] sm:$0xff] }
 0x170   : > { %v524_v26 = vadd.f32 %v521_v24, %v520_v23  ;;  %v532_v27 = vmul.f32 %v520_v23, %v520_v23  ;;  %v533_v28 = vmul.f32 %v521_v24, %v521_v24  ;;  %v826_v11 = vld [vmem:[#allocation3 + $0x8] sm:$0xff]  ;;  %v835_v13 = vmul.f32 %v825_v10, %v825_v10 }
 0x171   : > { %v827_v12 = vadd.f32 %v826_v11, %v825_v10  ;;  %v836_v14 = vmul.f32 %v826_v11, %v826_v11 }
 0x172   : > { %v525_v29 = vrot.slane %v524_v26, 4  ;;  %v534_v30 = vadd.f32 %v533_v28, %v532_v27 }
 0x173   : > { %v828_v15 = vrot.slane %v827_v12, 4  ;;  %v837_v16 = vadd.f32 %v836_v14, %v835_v13 }
 0x174   : > { %v526_v32 = vadd.f32 %v525_v29, %v524_v26  ;;  %v535_v33 = vrot.slane %v534_v30, 4 }
 0x175   : > { %v829_v17 = vadd.f32 %v828_v15, %v827_v12  ;;  %v838_v18 = vrot.slane %v837_v16, 4 }
 0x176   : > { %v527_v34 = vrot.slane %v526_v32, 2  ;;  %v536_v35 = vadd.f32 %v535_v33, %v534_v30 }
 0x178   : > { %v528_v37 = vadd.f32 %v527_v34, %v526_v32  ;;  %v537_v38 = vrot.slane %v536_v35, 2 }
 0x17a   : > { %v529_v39 = vrot.slane %v528_v37, 1  ;;  %v538_v40 = vadd.f32 %v537_v38, %v536_v35 }
 0x17c   : > { %v530_v42 = vadd.f32 %v529_v39, %v528_v37  ;;  %v539_v43 = vrot.slane %v538_v40, 1 }
 0x17e   : > { %v531_v44 = vmul.f32 0.0625, %v530_v42  ;;  %v540_v45 = vadd.f32 %v539_v43, %v538_v40 }
 0x180   : > { %v541_v47 = vmul.f32 0.0625, %v540_v45  ;;  %v542_v48 = vmul.f32 %v531_v44, %v531_v44  ;;  %v545_v52 = vsub.f32 %v520_v23, %v531_v44  ;;  %v546_v53 = vsub.f32 %v521_v24, %v531_v44 }
 0x182   : > { %v543_v49 = vsub.f32 %v541_v47, %v542_v48  ;;  %v1748_v48 = vld [vmem:[#allocation8 + $0x8] sm:$0xff]  }
 0x184   : > { %v544_v50 = vmax.f32 %v543_v49, 0.0  ;;  %v1749_v49 = vld [vmem:[#allocation8 + $0x10] sm:$0xff]  }
 0x186   : > { %v547_v51 = vadd.f32 1e-05, %v544_v50  ;;  %v1750_v50 = vld [vmem:[#allocation8 + $0x18] sm:$0xff]  }
 0x188   : > { %1763 = vrsqrt.f32 %v547_v51  ;;  %v1751_v51 = vld [vmem:[#allocation8 + $0x20] sm:$0xff]  }
 0x192   : > { %v1764_v54 = vpop.eup %1763 }
 0x193   : > { %v549_v56 = vmul.f32 %v1764_v54, %v545_v52  ;;  %v550_v57 = vmul.f32 %v1764_v54, %v546_v53  ;;  %v1752_v52 = vld [vmem:[#allocation8 + $0x28] sm:$0xff]  }
 0x195   : > { %v555_v59 = vmul.f32 %v2175_v55, %v549_v56  ;;  %v556_v60 = vmul.f32 %v2175_v55, %v550_v57 }
 0x197   : > { %v561_v61 = vadd.f32 %v2180_v58, %v555_v59  ;;  %v562_v62 = vadd.f32 %v2180_v58, %v556_v60 }
 0x199   : > { %v563_v63 = vmax.f32 %v561_v61, 0.0  ;;  %v564_v0 = vmax.f32 %v562_v62, 0.0 }
 0x19b   : > { %v565_v1 = vpack.c.bf16 %v564_v0, %v563_v63 }
 0x19d   : > { %1565 = vmatmul.mubr.bf16.vlgmr.msra.gmra.mrb[0].mxu0 %v565_v1 }
 0x19e   : > { %1589 = vmatpush3.bf16.msra.mxu0 %v2149_v19  ;;  %1604 = vmatprep.mubr.msk.bf16.mxu0 %vm1918_vm1, %v1917_v20  ;;  %v830_v19 = vrot.slane %v829_v17, 2 }
 0x19f   : > { %1590 = vmatprep.subr.bf16.mxu0 %v1917_v20 }
 0x1a2   : > { %1591 = vmatpush3.bf16.msra.mxu0 %v2154_v21  ;;  %v839_v21 = vadd.f32 %v838_v18, %v837_v16 }
 0x1a3   : > { %1592 = vmatprep.subr.bf16.mxu0 %v1917_v20 }
 0x1a4   : > { %v840_v23 = vrot.slane %v839_v21, 2 }
 0x1a6   : > { %1593 = vmatpush3.bf16.msra.mxu0 %v2162_v22  ;;  %v831_v22 = vadd.f32 %v830_v19, %v829_v17 }
 0x1a7   : > { %1594 = vmatprep.subr.bf16.mxu0 %v1917_v20 }
 0x1a8   : > { %v832_v24 = vrot.slane %v831_v22, 1 }
 0x1aa   : > { %1595 = vmatpush3.bf16.msra.mxu0 %v1734_v25  ;;  %v841_v25 = vadd.f32 %v840_v23, %v839_v21  ;;  %v833_v26 = vadd.f32 %v832_v24, %v831_v22 }
 0x1ab   : > { %1596 = vmatprep.subr.bf16.mxu0 %v1917_v20 }
 0x1ac   : > { %v842_v27 = vrot.slane %v841_v25, 1  ;;  %v834_v28 = vmul.f32 0.0625, %v833_v26 }
 0x1ae   : > { %1597 = vmatpush3.bf16.msra.mxu0 %v1735_v31  ;;  %v843_v29 = vadd.f32 %v842_v27, %v841_v25  ;;  %v845_v31 = vmul.f32 %v834_v28, %v834_v28  ;;  %v848_v35 = vsub.f32 %v825_v10, %v834_v28  ;;  %v2246_v27 = vld [vmem:[%s2314_s7 + $0x2] ss:$0 sm:$0xff] }
 0x1af   : > { %1598 = vmatprep.subr.bf16.mxu0 %v1917_v20 }
 0x1b0   : > { %v844_v30 = vmul.f32 0.0625, %v843_v29 }
 0x1b2   : > { %1599 = vmatpush3.bf16.msra.mxu0 %v1736_v36  ;;  %v846_v32 = vsub.f32 %v844_v30, %v845_v31  ;;  %v849_v36 = vsub.f32 %v826_v11, %v834_v28  ;;  %v2251_v30 = vld [vmem:[%s2314_s7 + $0x3] ss:$0 sm:$0xff] }
 0x1b3   : > { %1600 = vmatprep.subr.bf16.mxu0 %v1917_v20 }
 0x1b4   : > { %v847_v33 = vmax.f32 %v846_v32, 0.0 }
 0x1b6   : > { %1601 = vmatpush3.bf16.msra.mxu0 %v1737_v41  ;;  %v850_v34 = vadd.f32 1e-05, %v847_v33 }
 0x1b7   : > { %1602 = vmatprep.subr.bf16.mxu0 %v1917_v20 }
 0x1b8   : > { %1765 = vrsqrt.f32 %v850_v34 }
 0x1ba   : > { %1603 = vmatpush3.bf16.msra.mxu0 %v1738_v46  ;;  %v1747_v46 = vld [vmem:[#allocation8] sm:$0xff]  }
 0x1bb   : > { %1628 = vmatprep.subr.bf16.mxu0 %v1917_v20 }
 0x1c2   : > { %v1766_v37 = vpop.eup %1765 }
 0x1c3   : > { %v852_v38 = vmul.f32 %v1766_v37, %v848_v35  ;;  %v853_v39 = vmul.f32 %v1766_v37, %v849_v36 }
 0x1c5   : > { %v854_v40 = vmul.f32 %v2175_v55, %v852_v38  ;;  %v855_v41 = vmul.f32 %v2175_v55, %v853_v39 }
 0x1c7   : > { %v856_v42 = vadd.f32 %v2180_v58, %v854_v40  ;;  %v857_v43 = vadd.f32 %v2180_v58, %v855_v41 }
 0x1c9   : > { %v858_v44 = vmax.f32 %v856_v42, 0.0  ;;  %v859_v45 = vmax.f32 %v857_v43, 0.0 }
 0x1cb   : > { %v860_v47 = vpack.c.bf16 %v859_v45, %v858_v44 }
 0x1cd   : > { %1605 = vmatmul.mubr.bf16.vlgmr.msra.gmra.mrb[4].mxu0 %v860_v47 }
 0x1ce   : > { %1629 = vmatpush3.bf16.msra.mxu0 %v1747_v46  ;;  %1644 = vmatprep.mubr.msk.bf16.mxu0 %vm1918_vm1, %v1917_v20 }
 0x1cf   : > { %1630 = vmatprep.subr.bf16.mxu0 %v1917_v20 }
 0x1d2   : > { %1631 = vmatpush3.bf16.msra.mxu0 %v1748_v48 }
 0x1d3   : > { %1632 = vmatprep.subr.bf16.mxu0 %v1917_v20 }
 0x1d6   : > { %1633 = vmatpush3.bf16.msra.mxu0 %v1749_v49 }
 0x1d7   : > { %1634 = vmatprep.subr.bf16.mxu0 %v1917_v20 }
 0x1da   : > { %1635 = vmatpush3.bf16.msra.mxu0 %v1750_v50 }
 0x1db   : > { %1636 = vmatprep.subr.bf16.mxu0 %v1917_v20 }
 0x1de   : > { %1637 = vmatpush3.bf16.msra.mxu0 %v1751_v51 }
 0x1df   : > { %1638 = vmatprep.subr.bf16.mxu0 %v1917_v20 }
 0x1e2   : > { %1639 = vmatpush3.bf16.msra.mxu0 %v1752_v52 }
 0x1e3   : > { %1640 = vmatprep.subr.bf16.mxu0 %v1917_v20 }
 0x270   : > { %v664_v53 = vpop.f32.mrb[0].mxu0 }
 0x271   : > { %v1566_v54 = vpop.f32.mrb[1].mxu0  ;;  %v681_v56 = vmul.f32 %v664_v53, %v664_v53 }
 0x272   : > { %v667_v55 = vpop.f32.mrb[2].mxu0 }
 0x273   : > { %v673_v57 = vadd.f32 %v667_v55, %v664_v53  ;;  %v682_v58 = vmul.f32 %v667_v55, %v667_v55  ;;  %v1567_v59 = vpop.f32.mrb[3].mxu0 }
 0x275   : > { %v674_v60 = vrot.slane %v673_v57, 4  ;;  %v683_v61 = vadd.f32 %v682_v58, %v681_v56 }
 0x277   : > { %v675_v62 = vadd.f32 %v674_v60, %v673_v57  ;;  %v684_v63 = vrot.slane %v683_v61, 4 }
 0x279   : > { %v676_v0 = vrot.slane %v675_v62, 2  ;;  %v685_v1 = vadd.f32 %v684_v63, %v683_v61 }
 0x27b   : > { %v677_v10 = vadd.f32 %v676_v0, %v675_v62  ;;  %v686_v11 = vrot.slane %v685_v1, 2 }
 0x27d   : > { %v678_v12 = vrot.slane %v677_v10, 1  ;;  %v687_v13 = vadd.f32 %v686_v11, %v685_v1 }
 0x27f   : > { %v679_v14 = vadd.f32 %v678_v12, %v677_v10  ;;  %v688_v15 = vrot.slane %v687_v13, 1 }
 0x281   : > { %v680_v16 = vmul.f32 0.0625, %v679_v14  ;;  %v689_v17 = vadd.f32 %v688_v15, %v687_v13  ;;  %v1406_v14 = vld [vmem:[%s2314_s7 + $0x4] ss:$0 sm:$0xff] }
 0x283   : > { %v690_v18 = vmul.f32 0.0625, %v689_v17  ;;  %v691_v19 = vmul.f32 %v680_v16, %v680_v16  ;;  %v695_v21 = vsub.f32 %v667_v55, %v680_v16  ;;  %v694_v22 = vsub.f32 %v664_v53, %v680_v16 }
 0x285   : > { %v692_v23 = vsub.f32 %v690_v18, %v691_v19 }
 0x287   : > { %v693_v24 = vmax.f32 %v692_v23, 0.0  ;;  %v1755_v23 = vld [vmem:[#allocation9] sm:$0xff]  }
 0x289   : > { %v696_v25 = vadd.f32 1e-05, %v693_v24  ;;  %v1756_v24 = vld [vmem:[#allocation9 + $0x8] sm:$0xff]  }
 0x28b   : > { %1767 = vrsqrt.f32 %v696_v25  ;;  %v1757_v25 = vld [vmem:[#allocation9 + $0x10] sm:$0xff]  }
 0x295   : > { %v1768_v26 = vpop.eup %1767 }
 0x296   : > { %v699_v28 = vmul.f32 %v1768_v26, %v695_v21  ;;  %v698_v29 = vmul.f32 %v1768_v26, %v694_v22  ;;  %v1758_v26 = vld [vmem:[#allocation9 + $0x18] sm:$0xff]  }
 0x298   : > { %v705_v31 = vmul.f32 %v2246_v27, %v699_v28  ;;  %v704_v32 = vmul.f32 %v2246_v27, %v698_v29  ;;  %v1760_v28 = vld [vmem:[#allocation9 + $0x28] sm:$0xff]   ;;  %v1761_v29 = vld [vmem:[#allocation9 + $0x30] sm:$0xff]  }
 0x29a   : > { %v710_v33 = vadd.f32 %v2251_v30, %v704_v32  ;;  %v711_v34 = vadd.f32 %v2251_v30, %v705_v31 }
 0x29c   : > { %v712_v35 = vmax.f32 %v710_v33, 0.0  ;;  %v713_v36 = vmax.f32 %v711_v34, 0.0 }
 0x29e   : > { %v714_v37 = vpack.c.bf16 %v713_v36, %v712_v35 }
 0x2a0   : > { %1585 = vmatmul.mubr.bf16.vlgmr.msra.gmra.mrb[0].mxu1 %v714_v37 }
 0x2a1   : > { %1609 = vmatpush3.bf16.msra.mxu1 %v2199_v2  ;;  %1624 = vmatprep.mubr.msk.bf16.mxu1 %vm1918_vm1, %v1917_v20  ;;  %v1753_v2 = vld [vmem:[#allocation8 + $0x30] sm:$0xff]  }
 0x2a2   : > { %1610 = vmatprep.subr.bf16.mxu1 %v1917_v20  ;;  %1641 = vmatpush3.bf16.msra.mxu0 %v1753_v2 }
 0x2a3   : > { %1642 = vmatprep.subr.bf16.mxu0 %v1917_v20 }
 0x2a5   : > { %1611 = vmatpush3.bf16.msra.mxu1 %v2203_v3  ;;  %v1754_v3 = vld [vmem:[#allocation8 + $0x38] sm:$0xff]  }
 0x2a6   : > { %1612 = vmatprep.subr.bf16.mxu1 %v1917_v20  ;;  %1643 = vmatpush3.bf16.msra.mxu0 %v1754_v3 }
 0x2a9   : > { %1613 = vmatpush3.bf16.msra.mxu1 %v2207_v4  ;;  %v895_v4 = vpop.f32.mrb[4].mxu0 }
 0x2aa   : > { %1614 = vmatprep.subr.bf16.mxu1 %v1917_v20 }
 0x2ad   : > { %1615 = vmatpush3.bf16.msra.mxu1 %v2211_v5  ;;  %v910_v5 = vmul.f32 %v895_v4, %v895_v4 }
 0x2ae   : > { %1616 = vmatprep.subr.bf16.mxu1 %v1917_v20 }
 0x2b1   : > { %1617 = vmatpush3.bf16.msra.mxu1 %v2215_v6  ;;  %v1606_v6 = vpop.f32.mrb[5].mxu0 }
 0x2b2   : > { %1618 = vmatprep.subr.bf16.mxu1 %v1917_v20 }
 0x2b5   : > { %1619 = vmatpush3.bf16.msra.mxu1 %v2219_v7  ;;  %v898_v7 = vpop.f32.mrb[6].mxu0 }
 0x2b6   : > { %1620 = vmatprep.subr.bf16.mxu1 %v1917_v20  ;;  %v902_v38 = vadd.f32 %v898_v7, %v895_v4  ;;  %v911_v39 = vmul.f32 %v898_v7, %v898_v7  ;;  %v1607_v40 = vpop.f32.mrb[7].mxu0 }
 0x2b8   : > { %v912_v41 = vadd.f32 %v911_v39, %v910_v5 }
 0x2b9   : > { %1621 = vmatpush3.bf16.msra.mxu1 %v2223_v8  ;;  %v903_v8 = vrot.slane %v902_v38, 4 }
 0x2ba   : > { %1622 = vmatprep.subr.bf16.mxu1 %v1917_v20  ;;  %v913_v43 = vrot.slane %v912_v41, 4 }
 0x2bb   : > { %v904_v42 = vadd.f32 %v903_v8, %v902_v38 }
 0x2bc   : > { %v914_v44 = vadd.f32 %v913_v43, %v912_v41 }
 0x2bd   : > { %1623 = vmatpush3.bf16.msra.mxu1 %v2226_v9  ;;  %v905_v9 = vrot.slane %v904_v42, 2 }
 0x2be   : > { %1648 = vmatprep.subr.bf16.mxu1 %v1917_v20  ;;  %v915_v46 = vrot.slane %v914_v44, 2 }
 0x2bf   : > { %v906_v45 = vadd.f32 %v905_v9, %v904_v42 }
 0x2c0   : > { %v916_v48 = vadd.f32 %v915_v46, %v914_v44 }
 0x2c1   : > { %v907_v47 = vrot.slane %v906_v45, 1 }
 0x2c2   : > { %v917_v50 = vrot.slane %v916_v48, 1 }
 0x2c3   : > { %v908_v49 = vadd.f32 %v907_v47, %v906_v45 }
 0x2c4   : > { %v918_v52 = vadd.f32 %v917_v50, %v916_v48 }
 0x2c5   : > { %v909_v51 = vmul.f32 0.0625, %v908_v49 }
 0x2c6   : > { %v919_v53 = vmul.f32 0.0625, %v918_v52 }
 0x2c7   : > { %v920_v54 = vmul.f32 %v909_v51, %v909_v51  ;;  %v923_v55 = vsub.f32 %v895_v4, %v909_v51  ;;  %v924_v56 = vsub.f32 %v898_v7, %v909_v51 }
 0x2c9   : > { %v921_v57 = vsub.f32 %v919_v53, %v920_v54 }
 0x2cb   : > { %v922_v58 = vmax.f32 %v921_v57, 0.0 }
 0x2cd   : > { %v925_v59 = vadd.f32 1e-05, %v922_v58 }
 0x2cf   : > { %1769 = vrsqrt.f32 %v925_v59  ;;  %v1423_v59 = vld [vmem:[%s2314_s7 + $0x5] ss:$0 sm:$0xff] }
 0x2d9   : > { %v1770_v60 = vpop.eup %1769 }
 0x2da   : > { %v928_v61 = vmul.f32 %v1770_v60, %v924_v56  ;;  %v927_v62 = vmul.f32 %v1770_v60, %v923_v55 }
 0x2dc   : > { %v930_v63 = vmul.f32 %v2246_v27, %v928_v61  ;;  %v929_v0 = vmul.f32 %v2246_v27, %v927_v62  ;;  %v1759_v27 = vld [vmem:[#allocation9 + $0x20] sm:$0xff]  }
 0x2dd   : > { %v1424_v62 = vld [vmem:[%s2314_s7 + $0x6] ss:$0 sm:$0xff] }
 0x2de   : > { %v932_v1 = vadd.f32 %v2251_v30, %v930_v63  ;;  %v931_v10 = vadd.f32 %v2251_v30, %v929_v0  ;;  %v1762_v30 = vld [vmem:[#allocation9 + $0x38] sm:$0xff]  }
 0x2e0   : > { %v933_v11 = vmax.f32 %v931_v10, 0.0  ;;  %v934_v12 = vmax.f32 %v932_v1, 0.0 }
 0x2e2   : > { %v935_v13 = vpack.c.bf16 %v934_v12, %v933_v11 }
 0x2e4   : > { %1625 = vmatmul.mubr.bf16.vlgmr.msra.gmra.mrb[4].mxu1 %v935_v13 }
 0x2e5   : > { %1664 = vmatprep.mubr.msk.bf16.mxu1 %vm1918_vm1, %v1917_v20  ;;  %1649 = vmatpush3.bf16.msra.mxu1 %v1755_v23 }
 0x2e6   : > { %1650 = vmatprep.subr.bf16.mxu1 %v1917_v20 }
 0x2e9   : > { %1651 = vmatpush3.bf16.msra.mxu1 %v1756_v24 }
 0x2ea   : > { %1652 = vmatprep.subr.bf16.mxu1 %v1917_v20 }
 0x2ed   : > { %1653 = vmatpush3.bf16.msra.mxu1 %v1757_v25 }
 0x2ee   : > { %1654 = vmatprep.subr.bf16.mxu1 %v1917_v20 }
 0x2f1   : > { %1655 = vmatpush3.bf16.msra.mxu1 %v1758_v26 }
 0x2f2   : > { %1656 = vmatprep.subr.bf16.mxu1 %v1917_v20 }
 0x2f5   : > { %1657 = vmatpush3.bf16.msra.mxu1 %v1759_v27 }
 0x2f6   : > { %1658 = vmatprep.subr.bf16.mxu1 %v1917_v20 }
 0x2f9   : > { %1659 = vmatpush3.bf16.msra.mxu1 %v1760_v28 }
 0x2fa   : > { %1660 = vmatprep.subr.bf16.mxu1 %v1917_v20 }
 0x2fd   : > { %1661 = vmatpush3.bf16.msra.mxu1 %v1761_v29 }
 0x2fe   : > { %1662 = vmatprep.subr.bf16.mxu1 %v1917_v20 }
 0x301   : > { %1663 = vmatpush3.bf16.msra.mxu1 %v1762_v30 }
 0x373   : > { %v818_v15 = vpop.f32.mrb[0].mxu1 }
 0x374   : > { %v1586_v16 = vpop.f32.mrb[1].mxu1  ;;  %v819_v18 = vadd.f32 %v1406_v14, %v818_v15 }
 0x375   : > { %v821_v17 = vpop.f32.mrb[2].mxu1 }
 0x376   : > { %v822_v19 = vadd.f32 %v1406_v14, %v821_v17  ;;  %v1587_v21 = vpop.f32.mrb[3].mxu1 }
 0x378   : > { %v977_v22 = vpack.c.bf16 %v822_v19, %v819_v18 }
 0x37a   : > { %1645 = vmatmul.mubr.bf16.vlgmr.msra.gmra.mrb[8].mxu0 %v977_v22 }
 0x3b7   : > { %v970_v31 = vpop.f32.mrb[4].mxu1 }
 0x3b8   : > { %v971_v32 = vadd.f32 %v1406_v14, %v970_v31  ;;  %v1626_v33 = vpop.f32.mrb[5].mxu1 }
 0x3b9   : > { %v973_v34 = vpop.f32.mrb[6].mxu1 }
 0x3ba   : > { %v974_v35 = vadd.f32 %v1406_v14, %v973_v34  ;;  %v1627_v36 = vpop.f32.mrb[7].mxu1  ;;  %v1243_v37 = vmul.f32 %v971_v32, %v971_v32  ;;  %v1425_v14 = vld [vmem:[%s2314_s7 + $0x7] ss:$0 sm:$0xff] }
 0x3bc   : > { %1245 = vadd.xlane.f32.xlu0 %v1243_v37  ;;  %v1244_v2 = vmul.f32 %v974_v35, %v974_v35 }
 0x3c0   : > { %1247 = vadd.xlane.f32.xlu0 %v1244_v2  ;;  %v1269_v2 = vlaneseq }
 0x449   : > { %v1246_v26 = vpop.xlane.xlu0 %1245 }
 0x44a   : > { %v1255_v28 = vmax.f32 %v1246_v26, 1e-10 }
 0x44d   : > { %v1076_v3 = vpop.f32.mrb[8].mxu0  ;;  %v1248_v30 = vpop.xlane.xlu0 %1247 }
 0x44e   : > { %v1646_v4 = vpop.f32.mrb[9].mxu0  ;;  %v1093_v6 = vmul.f32 %v1076_v3, %v1076_v3  ;;  %v1256_v34 = vmax.f32 %v1248_v30, 1e-10 }
 0x44f   : > { %v1079_v5 = vpop.f32.mrb[10].mxu0 }
 0x450   : > { %v1085_v7 = vadd.f32 %v1079_v5, %v1076_v3  ;;  %v1094_v38 = vmul.f32 %v1079_v5, %v1079_v5  ;;  %v1647_v39 = vpop.f32.mrb[11].mxu0 }
 0x452   : > { %v1086_v20 = vrot.slane %v1085_v7, 4  ;;  %v1095_v40 = vadd.f32 %v1094_v38, %v1093_v6 }
 0x454   : > { %v1087_v8 = vadd.f32 %v1086_v20, %v1085_v7  ;;  %v1096_v41 = vrot.slane %v1095_v40, 4 }
 0x456   : > { %v1088_v42 = vrot.slane %v1087_v8, 2  ;;  %v1097_v43 = vadd.f32 %v1096_v41, %v1095_v40 }
 0x458   : > { %v1089_v9 = vadd.f32 %v1088_v42, %v1087_v8  ;;  %v1098_v44 = vrot.slane %v1097_v43, 2 }
 0x45a   : > { %v1090_v45 = vrot.slane %v1089_v9, 1  ;;  %v1099_v46 = vadd.f32 %v1098_v44, %v1097_v43 }
 0x45c   : > { %v1091_v47 = vadd.f32 %v1090_v45, %v1089_v9  ;;  %v1100_v48 = vrot.slane %v1099_v46, 1 }
 0x45e   : > { %v1092_v49 = vmul.f32 0.0625, %v1091_v47  ;;  %v1101_v50 = vadd.f32 %v1100_v48, %v1099_v46 }
 0x460   : > { %v1102_v51 = vmul.f32 0.0625, %v1101_v50  ;;  %v1103_v52 = vmul.f32 %v1092_v49, %v1092_v49  ;;  %v1106_v53 = vsub.f32 %v1076_v3, %v1092_v49  ;;  %v1107_v54 = vsub.f32 %v1079_v5, %v1092_v49 }
 0x461   : > { %v1272_v5 = vshrl.u32 %v1269_v2, 7 }
 0x462   : > { %v1104_v55 = vsub.f32 %v1102_v51, %v1103_v52 }
 0x464   : > { %v1105_v56 = vmax.f32 %v1104_v55, 0.0 }
 0x466   : > { %v1108_v57 = vadd.f32 1e-05, %v1105_v56 }
 0x468   : > { %1771 = vrsqrt.f32 %v1108_v57 }
 0x472   : > { %v1772_v58 = vpop.eup %1771 }
 0x473   : > { %v1110_v60 = vmul.f32 %v1772_v58, %v1106_v53  ;;  %v1111_v61 = vmul.f32 %v1772_v58, %v1107_v54 }
 0x475   : > { %v1116_v63 = vmul.f32 %v1423_v59, %v1110_v60  ;;  %v1117_v0 = vmul.f32 %v1423_v59, %v1111_v61 }
 0x477   : > { %v1123_v1 = vadd.f32 %v1424_v62, %v1117_v0  ;;  %v1122_v10 = vadd.f32 %v1424_v62, %v1116_v63 }
 0x479   : > { %v1124_v11 = vmax.f32 %v1122_v10, 0.0  ;;  %v1125_v12 = vmax.f32 %v1123_v1, 0.0 }
 0x47b   : > { %v1126_v13 = vpack.c.bf16 %v1125_v12, %v1124_v11 }
 0x47d   : > { %1665 = vmatmul.mubr.bf16.vlgmr.msra.gmra.mrb[8].mxu1 %v1126_v13 }
 0x550   : > { %v1230_v15 = vpop.f32.mrb[8].mxu1 }
 0x551   : > { %v1231_v16 = vadd.f32 %v1425_v14, %v1230_v15  ;;  %v1666_v17 = vpop.f32.mrb[9].mxu1 }
 0x552   : > { %v1233_v18 = vpop.f32.mrb[10].mxu1 }
 0x553   : > { %v1234_v19 = vadd.f32 %v1425_v14, %v1233_v18  ;;  %v1667_v21 = vpop.f32.mrb[11].mxu1  ;;  %v1249_v22 = vmul.f32 %v1231_v16, %v1231_v16  ;;  %v1237_v23 = vmul.f32 %v1231_v16, %v971_v32  ;;  %v1270_v32 = vand.u32 127, %v1269_v2 }
 0x555   : > { %1251 = vadd.xlane.f32.xlu1 %v1249_v22  ;;  %1239 = vadd.xlane.f32.xlu0 %v1237_v23  ;;  %v1250_v24 = vmul.f32 %v1234_v19, %v1234_v19  ;;  %v1238_v25 = vmul.f32 %v1234_v19, %v974_v35  ;;  %v1275_v35 = vadd.s32 4294967288, %v1270_v32  ;;  %v1273_v39 = vsub.s32 %v1270_v32, %v1272_v5 }
 0x557   : > { %v1278_v40 = vsub.s32 %v1275_v35, %v1272_v5 }
 0x559   : > { %1253 = vadd.xlane.f32.xlu1 %v1250_v24 }
 0x55d   : > { %1241 = vadd.xlane.f32.xlu1 %v1238_v25 }
 0x5e2   : > { %v1252_v27 = vpop.xlane.xlu1 %1251  ;;  %v1240_v4 = vpop.xlane.xlu0 %1239 }
 0x5e3   : > { %v1257_v29 = vmax.f32 %v1252_v27, 1e-10 }
 0x5e5   : > { %v1259_v31 = vmul.f32 %v1257_v29, %v1255_v28 }
 0x5e6   : > { %v1254_v33 = vpop.xlane.xlu1 %1253 }
 0x5e7   : > { %1773 = vrsqrt.f32 %v1259_v31  ;;  %v1258_v36 = vmax.f32 %v1254_v33, 1e-10 }
 0x5e9   : > { %v1260_v37 = vmul.f32 %v1258_v36, %v1256_v34 }
 0x5ea   : > { %v1242_v38 = vpop.xlane.xlu1 %1241 }
 0x5eb   : > { %1775 = vrsqrt.f32 %v1260_v37 }
 0x5f1   : > { %v1774_v3 = vpop.eup %1773 }
 0x5f2   : > { %v1263_v6 = vmul.f32 %v1774_v3, %v1240_v4 }
 0x5f4   : > { %v1265_v20 = vsub.f32 1.0, %v1263_v6 }
 0x5f5   : > { %v1776_v7 = vpop.eup %1775 }
 0x5f6   : > { %v1264_v8 = vmul.f32 %v1776_v7, %v1242_v38  ;;  %v1274_v42 = vrot.slane %v1265_v20, %v1273_v39 }
 0x5f8   : > { %v1266_v41 = vsub.f32 1.0, %v1264_v8 }
 0x5fa   : > { %v1279_v43 = vrot.slane %v1266_v41, %v1278_v40 }
 0x5fc   : > { %v1281_v9 = vsel %vm1280_vm2, %v1279_v43, %v1274_v42 }
 0x5fd   : > { %1284 = vst.msk [vmem:[%s2315_s8] sm:$0x1] %vm1283_vm3, %v1281_v9 }
 0x5fe PF: > { %s21_s27 = sadd.s32 1, %s1907_s27  }
 0x5ff   : > { %p18_p8 = scmp.ge.s32.totalorder %s21_s27, 4  }
 0x601   :  { %20 = sbr.rel (!%p18_p8) target bundleno = 3 (0x3), region = 104 }
 0x608   :  { %1296 = vsyncpa [#allocation5], 1 }
 0x609   :  { %1298 = vsyncpa [#allocation5 + $0x1], 1 }
 0x60a   :  { %1299 = vsyncpa [#allocation7], 1 }
 0x60b   :  { %1300 = vsyncpa [#allocation10], 1 }

</bundles_post_ra>
